<compile_context>
chip_gen: v7x
topology: tpu7x:2x2x1
jax: 0.10.0
libtpu: 0.0.40
codegen_flags: <defaults>
</compile_context>

<pallas_src>
import functools
import math

import jax
import jax.numpy as jnp
from jax import lax
from jax.experimental import pallas as pl
from jax.experimental.pallas import tpu as pltpu


def _encoder_lstm_kernel(tok_ref,      # scalar-prefetch: (T,) int32 token ids (SMEM)
                         xproj_ref,    # (V, 4*Hp) f32: emb @ W_ih^T + (b_ih+b_hh), gates [i,f,o,g]
                         whh_ref,      # (Hp, 4*Hp) f32: W_hh^T packed, gate cols [i,f,o,g]
                         h0_ref,       # (1, Hp) f32 initial hidden (zero-padded)
                         c0_ref,       # (1, Hp) f32 initial cell  (zero-padded)
                         out_ref,      # (T, Hp) f32 per-step hidden states (resident)
                         c_out_ref,    # (1, Hp) f32 final cell state
                         *, seq_len, vocab):
    Hp = whh_ref.shape[0]
    w_hh = whh_ref[...]                                   # loaded once, resident across steps

    def step(t, carry):
        h, c = carry                                      # (1, Hp) f32 each
        tok = jnp.clip(tok_ref[t], 0, vocab - 1)          # VMEM gather has no bounds check
        x_gates = xproj_ref[pl.ds(tok, 1), :]             # (1, 4Hp): x @ W_ih^T + bias (precomputed)
        # Recurrent matmul only (K = Hp); f32 accumulate on the MXU.
        gates = x_gates + jnp.dot(h, w_hh, preferred_element_type=jnp.float32)
        # Gate layout [i, f, o | g]: one sigmoid over 3*Hp lanes, one tanh over Hp lanes.
        sig = jax.nn.sigmoid(gates[:, :3 * Hp])
        i_g = sig[:, 0 * Hp:1 * Hp]
        f_g = sig[:, 1 * Hp:2 * Hp]
        o_g = sig[:, 2 * Hp:3 * Hp]
        g_g = jnp.tanh(gates[:, 3 * Hp:4 * Hp])
        c_new = f_g * c + i_g * g_g
        h_new = o_g * jnp.tanh(c_new)
        out_ref[pl.ds(t, 1), :] = h_new.astype(out_ref.dtype)
        return h_new, c_new

    # nn.Dropout in eval mode is identity (already folded into x_proj).
    # TODO(synk): training-mode dropout (mask + 1/(1-p) scale via pltpu.prng_*) not implemented.
    _, c_fin = lax.fori_loop(0, seq_len, step, (h0_ref[...], c0_ref[...]), unroll=True)
    c_out_ref[...] = c_fin.astype(c_out_ref.dtype)


def encoder_rnn_forward(tokens, hidden, params):
    """Pallas equivalent of EncoderRNN.forward applied to a sequence of T tokens.

    tokens: (T,) int32 token indices (T=1 reproduces the PyTorch single-step forward)
    hidden: (h0, c0), each (1, 1, H)   (n_layers=1, batch=1)
    params: dict from init_params (padded / fused tables)
    returns (outputs (T, 1, H), (h (1, 1, H), c (1, 1, H)))
    """
    h0, c0 = hidden
    x_proj, w_hh = params["x_proj"], params["w_hh"]
    V = x_proj.shape[0]
    Hp = w_hh.shape[0]
    H = h0.shape[-1]
    T = int(tokens.shape[0])

    # Zero-padded initial state: padded lanes of h/c then stay exactly 0 through the
    # recurrence (padded weight/bias columns are zero => padded gate pre-activations
    # are zero => c_pad = 0.5*0 + 0.5*tanh(0) = 0 and h_pad = 0.5*tanh(0) = 0).
    h0_pad = jnp.zeros((1, Hp), jnp.float32).at[:, :H].set(h0.reshape(1, H))
    c0_pad = jnp.zeros((1, Hp), jnp.float32).at[:, :H].set(c0.reshape(1, H))

    kernel = functools.partial(_encoder_lstm_kernel, seq_len=T, vocab=V)

    grid_spec = pltpu.PrefetchScalarGridSpec(
        num_scalar_prefetch=1,
        grid=(1,),                                         # single kernel invocation
        in_specs=[
            # Everything resident in VMEM for the whole (in-kernel) time loop.
            pl.BlockSpec((V, 4 * Hp), lambda i, tok: (0, 0)),    # x_proj table
            pl.BlockSpec((Hp, 4 * Hp), lambda i, tok: (0, 0)),   # recurrent weights
            pl.BlockSpec((1, Hp), lambda i, tok: (0, 0)),        # h0
            pl.BlockSpec((1, Hp), lambda i, tok: (0, 0)),        # c0
        ],
        out_specs=[
            pl.BlockSpec((T, Hp), lambda i, tok: (0, 0)),        # per-step outputs
            pl.BlockSpec((1, Hp), lambda i, tok: (0, 0)),        # final cell state
        ],
    )

    outs_pad, c_pad = pl.pallas_call(
        kernel,
        grid_spec=grid_spec,
        out_shape=(
            jax.ShapeDtypeStruct((T, Hp), jnp.float32),
            jax.ShapeDtypeStruct((1, Hp), jnp.float32),
        ),
        compiler_params=pltpu.CompilerParams(
            dimension_semantics=("arbitrary",),           # serial recurrence, one step
            vmem_limit_bytes=4 * 1024 * 1024,             # actual footprint < 1 MiB
        ),
    )(tokens.astype(jnp.int32), x_proj, w_hh, h0_pad, c0_pad)

    outputs = outs_pad[:, :H].reshape(T, 1, H)
    h_new = outs_pad[T - 1:T, :H].reshape(1, 1, H)        # final hidden == last output row
    c_new = c_pad[:, :H].reshape(1, 1, H)
    return outputs, (h_new, c_new)


def init_params(key, input_size, hidden_size):
    """PyTorch-style init, then fuse/pad for the kernel.

    - embedding: nn.Embedding default N(0, 1)
    - LSTM weights/biases: U(-1/sqrt(H), 1/sqrt(H)), gate order [i, f, g, o]
    - x_proj = embedding @ W_ih^T + (b_ih + b_hh): the whole input projection is a
      (V, 4*Hp) lookup table (dropout is eval-mode identity), gate cols [i, f, o, g].
    - w_hh: W_hh^T packed to (Hp, 4*Hp) with the same [i, f, o, g] column order.
    Padded rows/columns are zero, which keeps the padded lanes of h/c exactly zero.
    """
    H, V = hidden_size, input_size
    Hp = max(128, ((H + 127) // 128) * 128)
    bound = 1.0 / math.sqrt(H)

    k_emb, k_wih, k_whh, k_bih, k_bhh = jax.random.split(key, 5)
    emb = jax.random.normal(k_emb, (V, H), dtype=jnp.float32)
    w_ih = jax.random.uniform(k_wih, (4 * H, H), jnp.float32, -bound, bound)
    w_hh = jax.random.uniform(k_whh, (4 * H, H), jnp.float32, -bound, bound)
    b_ih = jax.random.uniform(k_bih, (4 * H,), jnp.float32, -bound, bound)
    b_hh = jax.random.uniform(k_bhh, (4 * H,), jnp.float32, -bound, bound)

    # Hoisted input projection (off the recurrent critical path), PyTorch order [i,f,g,o].
    x_proj_raw = emb @ w_ih.T + (b_ih + b_hh)[None, :]    # (V, 4H)
    w_hh_t = w_hh.T                                       # (H, 4H)

    # Repack gates [i, f, g, o] -> [i, f, o, g] at Hp-aligned column offsets so the
    # kernel needs one sigmoid (lanes [0, 3Hp)) and one tanh (lanes [3Hp, 4Hp)).
    order = (0, 1, 3, 2)                                  # new slot k holds PyTorch gate order[k]
    x_proj = jnp.zeros((V, 4 * Hp), jnp.float32)
    w_hh_pack = jnp.zeros((Hp, 4 * Hp), jnp.float32)
    for k, g in enumerate(order):
        x_proj = x_proj.at[:, k * Hp:k * Hp + H].set(x_proj_raw[:, g * H:(g + 1) * H])
        w_hh_pack = w_hh_pack.at[:H, k * Hp:k * Hp + H].set(w_hh_t[:, g * H:(g + 1) * H])

    return {
        "x_proj": x_proj,
        "w_hh": w_hh_pack,
        # Raw PyTorch-layout weights, kept only for the independent reference check.
        "raw": {"emb": emb, "w_ih": w_ih, "w_hh": w_hh, "b_ih": b_ih, "b_hh": b_hh},
    }


def _reference_forward(tokens, h0, c0, raw):
    """Pure-JAX f32 reference with PyTorch nn.LSTM semantics (dropout in eval mode)."""
    emb, w_ih, w_hh = raw["emb"], raw["w_ih"], raw["w_hh"]
    b = raw["b_ih"] + raw["b_hh"]
    H = h0.shape[-1]
    h = h0.reshape(1, H).astype(jnp.float32)
    c = c0.reshape(1, H).astype(jnp.float32)
    outs = []
    for t in range(int(tokens.shape[0])):
        x = emb[tokens[t]][None, :]                       # embedding -> dropout(eval)=identity
        gates = x @ w_ih.T + h @ w_hh.T + b[None, :]      # PyTorch gate order [i, f, g, o]
        i_g = jax.nn.sigmoid(gates[:, 0 * H:1 * H])
        f_g = jax.nn.sigmoid(gates[:, 1 * H:2 * H])
        g_g = jnp.tanh(gates[:, 2 * H:3 * H])
        o_g = jax.nn.sigmoid(gates[:, 3 * H:4 * H])
        c = f_g * c + i_g * g_g
        h = o_g * jnp.tanh(c)
        outs.append(h)
    return jnp.stack(outs, 0), h, c


if __name__ == "__main__":
    input_size = 16    # vocab size V
    hidden_size = 32   # H
    seq_len = 8        # T (in-kernel unrolled time loop)

    key = jax.random.PRNGKey(0)
    k_par, k_tok, k_h, k_c = jax.random.split(key, 4)

    params = init_params(k_par, input_size, hidden_size)

    tokens = jax.random.randint(k_tok, (seq_len,), 0, input_size, dtype=jnp.int32)
    h0 = jax.random.normal(k_h, (1, 1, hidden_size), dtype=jnp.float32)
    c0 = jax.random.normal(k_c, (1, 1, hidden_size), dtype=jnp.float32)

    # Sequence encoding (single pallas_call, unrolled in-kernel time loop).
    outputs, (h_new, c_new) = encoder_rnn_forward(tokens, (h0, c0), params)
    jax.block_until_ready((outputs, h_new, c_new))
    assert outputs.shape == (seq_len, 1, hidden_size)
    assert h_new.shape == (1, 1, hidden_size)
    assert c_new.shape == (1, 1, hidden_size)

    # Numerical check against an independent pure-JAX reference built from the RAW
    # (unfused, unpadded) PyTorch-layout weights — validates the fusion/packing too.
    ref_out, ref_h, ref_c = _reference_forward(tokens, h0, c0, params["raw"])
    tol = 2e-3
    assert float(jnp.max(jnp.abs(outputs.reshape(seq_len, hidden_size)
                                 - ref_out.reshape(seq_len, hidden_size)))) < tol
    assert float(jnp.max(jnp.abs(h_new.reshape(1, hidden_size) - ref_h))) < tol
    assert float(jnp.max(jnp.abs(c_new.reshape(1, hidden_size) - ref_c))) < tol

    # Single-token call: exact EncoderRNN.forward(input, hidden) semantics (T = 1).
    out1, (h1, c1) = encoder_rnn_forward(tokens[:1], (h0, c0), params)
    jax.block_until_ready((out1, h1, c1))
    assert out1.shape == (1, 1, hidden_size)
    assert h1.shape == (1, 1, hidden_size) and c1.shape == (1, 1, hidden_size)
    ref_out1, ref_h1, ref_c1 = _reference_forward(tokens[:1], h0, c0, params["raw"])
    assert float(jnp.max(jnp.abs(out1.reshape(1, hidden_size)
                                 - ref_out1.reshape(1, hidden_size)))) < tol
    assert float(jnp.max(jnp.abs(c1.reshape(1, hidden_size) - ref_c1))) < tol

    print("KERNEL_OK")
</pallas_src>

<mosaic_0001>
module attributes {stable_mosaic.version = 11 : i64} {
  func.func @_encoder_lstm_kernel(%arg0: i32, %arg1: memref<8xi32, #tpu.memory_space<smem>>, %arg2: memref<16x512xf32, #tpu.memory_space<vmem>>, %arg3: memref<128x512xf32, #tpu.memory_space<vmem>>, %arg4: memref<1x128xf32, #tpu.memory_space<vmem>>, %arg5: memref<1x128xf32, #tpu.memory_space<vmem>>, %arg6: memref<8x128xf32, #tpu.memory_space<vmem>>, %arg7: memref<1x128xf32, #tpu.memory_space<vmem>>) attributes {dimension_semantics = [#tpu.dimension_semantics<arbitrary>], iteration_bounds = array<i64: 1>, scalar_prefetch = 1 : i64, scratch_operands = 0 : i64, tpu.core_type = #tpu.core_type<tc>, window_params = [{pipeline_mode = #tpu.pipeline_mode<synchronous>, transform_indices = @transform_0, window_bounds = array<i64: 16, 512>}, {pipeline_mode = #tpu.pipeline_mode<synchronous>, transform_indices = @transform_1, window_bounds = array<i64: 128, 512>}, {pipeline_mode = #tpu.pipeline_mode<synchronous>, transform_indices = @transform_2, window_bounds = array<i64: 1, 128>}, {pipeline_mode = #tpu.pipeline_mode<synchronous>, transform_indices = @transform_3, window_bounds = array<i64: 1, 128>}, {pipeline_mode = #tpu.pipeline_mode<synchronous>, transform_indices = @transform_4, window_bounds = array<i64: 8, 128>}, {pipeline_mode = #tpu.pipeline_mode<synchronous>, transform_indices = @transform_5, window_bounds = array<i64: 1, 128>}]} {
    %c0 = arith.constant 0 : index
    %c0_0 = arith.constant 0 : index
    %0 = vector.load %arg3[%c0, %c0_0] : memref<128x512xf32, #tpu.memory_space<vmem>>, vector<128x512xf32>
    %c0_1 = arith.constant 0 : index
    %c0_2 = arith.constant 0 : index
    %1 = vector.load %arg4[%c0_1, %c0_2] : memref<1x128xf32, #tpu.memory_space<vmem>>, vector<1x128xf32>
    %c0_3 = arith.constant 0 : index
    %c0_4 = arith.constant 0 : index
    %2 = vector.load %arg5[%c0_3, %c0_4] : memref<1x128xf32, #tpu.memory_space<vmem>>, vector<1x128xf32>
    %c0_i32 = arith.constant 0 : i32
    %3 = arith.index_cast %c0_i32 : i32 to index
    %4 = memref.load %arg1[%3] : memref<8xi32, #tpu.memory_space<smem>>
    %c0_i32_5 = arith.constant 0 : i32
    %c15_i32 = arith.constant 15 : i32
    %5 = arith.maxsi %c0_i32_5, %4 : i32
    %6 = arith.minsi %c15_i32, %5 : i32
    %7 = arith.index_cast %6 : i32 to index
    %c0_6 = arith.constant 0 : index
    %8 = vector.load %arg2[%7, %c0_6] : memref<16x512xf32, #tpu.memory_space<vmem>>, vector<1x512xf32>
    %cst = arith.constant dense<0.000000e+00> : vector<1x512xf32>
    %9 = tpu.matmul %1, %0, %cst {dimension_numbers = #tpu.dot_dimension_numbers<[1], [0], [0], [1], [0, 0, 1, 1], [], []>} : vector<1x128xf32>, vector<128x512xf32>, vector<1x512xf32> -> vector<1x512xf32>
    %10 = arith.addf %8, %9 : vector<1x512xf32>
    %11 = vector.extract_strided_slice %10 {offsets = [0, 0], sizes = [1, 384], strides = [1, 1]} : vector<1x512xf32> to vector<1x384xf32>
    %12 = arith.negf %11 : vector<1x384xf32>
    %13 = math.exp %12 : vector<1x384xf32>
    %cst_7 = arith.constant 1.000000e+00 : f32
    %14 = vector.broadcast %cst_7 : f32 to vector<1x384xf32>
    %15 = arith.addf %14, %13 : vector<1x384xf32>
    %16 = arith.divf %14, %15 : vector<1x384xf32>
    %17 = vector.extract_strided_slice %16 {offsets = [0, 0], sizes = [1, 128], strides = [1, 1]} : vector<1x384xf32> to vector<1x128xf32>
    %18 = vector.extract_strided_slice %16 {offsets = [0, 128], sizes = [1, 128], strides = [1, 1]} : vector<1x384xf32> to vector<1x128xf32>
    %19 = vector.extract_strided_slice %16 {offsets = [0, 256], sizes = [1, 128], strides = [1, 1]} : vector<1x384xf32> to vector<1x128xf32>
    %20 = vector.extract_strided_slice %10 {offsets = [0, 384], sizes = [1, 128], strides = [1, 1]} : vector<1x512xf32> to vector<1x128xf32>
    %21 = math.tanh %20 : vector<1x128xf32>
    %22 = arith.mulf %18, %2 : vector<1x128xf32>
    %23 = arith.mulf %17, %21 : vector<1x128xf32>
    %24 = arith.addf %22, %23 : vector<1x128xf32>
    %25 = math.tanh %24 : vector<1x128xf32>
    %26 = arith.mulf %19, %25 : vector<1x128xf32>
    %27 = arith.index_cast %c0_i32 : i32 to index
    %c0_8 = arith.constant 0 : index
    %28 = vector.load %arg6[%27, %c0_8] : memref<8x128xf32, #tpu.memory_space<vmem>>, vector<1x128xf32>
    tpu.vector_store %arg6[%27, %c0_8], %26 {strides = array<i32>} : memref<8x128xf32, #tpu.memory_space<vmem>>, vector<1x128xf32>,
    %c1_i32 = arith.constant 1 : i32
    %29 = arith.index_cast %c1_i32 : i32 to index
    %30 = memref.load %arg1[%29] : memref<8xi32, #tpu.memory_space<smem>>
    %c0_i32_9 = arith.constant 0 : i32
    %c15_i32_10 = arith.constant 15 : i32
    %31 = arith.maxsi %c0_i32_9, %30 : i32
    %32 = arith.minsi %c15_i32_10, %31 : i32
    %33 = arith.index_cast %32 : i32 to index
    %c0_11 = arith.constant 0 : index
    %34 = vector.load %arg2[%33, %c0_11] : memref<16x512xf32, #tpu.memory_space<vmem>>, vector<1x512xf32>
    %cst_12 = arith.constant dense<0.000000e+00> : vector<1x512xf32>
    %35 = tpu.matmul %26, %0, %cst_12 {dimension_numbers = #tpu.dot_dimension_numbers<[1], [0], [0], [1], [0, 0, 1, 1], [], []>} : vector<1x128xf32>, vector<128x512xf32>, vector<1x512xf32> -> vector<1x512xf32>
    %36 = arith.addf %34, %35 : vector<1x512xf32>
    %37 = vector.extract_strided_slice %36 {offsets = [0, 0], sizes = [1, 384], strides = [1, 1]} : vector<1x512xf32> to vector<1x384xf32>
    %38 = arith.negf %37 : vector<1x384xf32>
    %39 = math.exp %38 : vector<1x384xf32>
    %cst_13 = arith.constant 1.000000e+00 : f32
    %40 = vector.broadcast %cst_13 : f32 to vector<1x384xf32>
    %41 = arith.addf %40, %39 : vector<1x384xf32>
    %42 = arith.divf %40, %41 : vector<1x384xf32>
    %43 = vector.extract_strided_slice %42 {offsets = [0, 0], sizes = [1, 128], strides = [1, 1]} : vector<1x384xf32> to vector<1x128xf32>
    %44 = vector.extract_strided_slice %42 {offsets = [0, 128], sizes = [1, 128], strides = [1, 1]} : vector<1x384xf32> to vector<1x128xf32>
    %45 = vector.extract_strided_slice %42 {offsets = [0, 256], sizes = [1, 128], strides = [1, 1]} : vector<1x384xf32> to vector<1x128xf32>
    %46 = vector.extract_strided_slice %36 {offsets = [0, 384], sizes = [1, 128], strides = [1, 1]} : vector<1x512xf32> to vector<1x128xf32>
    %47 = math.tanh %46 : vector<1x128xf32>
    %48 = arith.mulf %44, %24 : vector<1x128xf32>
    %49 = arith.mulf %43, %47 : vector<1x128xf32>
    %50 = arith.addf %48, %49 : vector<1x128xf32>
    %51 = math.tanh %50 : vector<1x128xf32>
    %52 = arith.mulf %45, %51 : vector<1x128xf32>
    %53 = arith.index_cast %c1_i32 : i32 to index
    %c0_14 = arith.constant 0 : index
    %54 = vector.load %arg6[%53, %c0_14] : memref<8x128xf32, #tpu.memory_space<vmem>>, vector<1x128xf32>
    tpu.vector_store %arg6[%53, %c0_14], %52 {strides = array<i32>} : memref<8x128xf32, #tpu.memory_space<vmem>>, vector<1x128xf32>,
    %c2_i32 = arith.constant 2 : i32
    %55 = arith.index_cast %c2_i32 : i32 to index
    %56 = memref.load %arg1[%55] : memref<8xi32, #tpu.memory_space<smem>>
    %c0_i32_15 = arith.constant 0 : i32
    %c15_i32_16 = arith.constant 15 : i32
    %57 = arith.maxsi %c0_i32_15, %56 : i32
    %58 = arith.minsi %c15_i32_16, %57 : i32
    %59 = arith.index_cast %58 : i32 to index
    %c0_17 = arith.constant 0 : index
    %60 = vector.load %arg2[%59, %c0_17] : memref<16x512xf32, #tpu.memory_space<vmem>>, vector<1x512xf32>
    %cst_18 = arith.constant dense<0.000000e+00> : vector<1x512xf32>
    %61 = tpu.matmul %52, %0, %cst_18 {dimension_numbers = #tpu.dot_dimension_numbers<[1], [0], [0], [1], [0, 0, 1, 1], [], []>} : vector<1x128xf32>, vector<128x512xf32>, vector<1x512xf32> -> vector<1x512xf32>
    %62 = arith.addf %60, %61 : vector<1x512xf32>
    %63 = vector.extract_strided_slice %62 {offsets = [0, 0], sizes = [1, 384], strides = [1, 1]} : vector<1x512xf32> to vector<1x384xf32>
    %64 = arith.negf %63 : vector<1x384xf32>
    %65 = math.exp %64 : vector<1x384xf32>
    %cst_19 = arith.constant 1.000000e+00 : f32
    %66 = vector.broadcast %cst_19 : f32 to vector<1x384xf32>
    %67 = arith.addf %66, %65 : vector<1x384xf32>
    %68 = arith.divf %66, %67 : vector<1x384xf32>
    %69 = vector.extract_strided_slice %68 {offsets = [0, 0], sizes = [1, 128], strides = [1, 1]} : vector<1x384xf32> to vector<1x128xf32>
    %70 = vector.extract_strided_slice %68 {offsets = [0, 128], sizes = [1, 128], strides = [1, 1]} : vector<1x384xf32> to vector<1x128xf32>
    %71 = vector.extract_strided_slice %68 {offsets = [0, 256], sizes = [1, 128], strides = [1, 1]} : vector<1x384xf32> to vector<1x128xf32>
    %72 = vector.extract_strided_slice %62 {offsets = [0, 384], sizes = [1, 128], strides = [1, 1]} : vector<1x512xf32> to vector<1x128xf32>
    %73 = math.tanh %72 : vector<1x128xf32>
    %74 = arith.mulf %70, %50 : vector<1x128xf32>
    %75 = arith.mulf %69, %73 : vector<1x128xf32>
    %76 = arith.addf %74, %75 : vector<1x128xf32>
    %77 = math.tanh %76 : vector<1x128xf32>
    %78 = arith.mulf %71, %77 : vector<1x128xf32>
    %79 = arith.index_cast %c2_i32 : i32 to index
    %c0_20 = arith.constant 0 : index
    %80 = vector.load %arg6[%79, %c0_20] : memref<8x128xf32, #tpu.memory_space<vmem>>, vector<1x128xf32>
    tpu.vector_store %arg6[%79, %c0_20], %78 {strides = array<i32>} : memref<8x128xf32, #tpu.memory_space<vmem>>, vector<1x128xf32>,
    %c3_i32 = arith.constant 3 : i32
    %81 = arith.index_cast %c3_i32 : i32 to index
    %82 = memref.load %arg1[%81] : memref<8xi32, #tpu.memory_space<smem>>
    %c0_i32_21 = arith.constant 0 : i32
    %c15_i32_22 = arith.constant 15 : i32
    %83 = arith.maxsi %c0_i32_21, %82 : i32
    %84 = arith.minsi %c15_i32_22, %83 : i32
    %85 = arith.index_cast %84 : i32 to index
    %c0_23 = arith.constant 0 : index
    %86 = vector.load %arg2[%85, %c0_23] : memref<16x512xf32, #tpu.memory_space<vmem>>, vector<1x512xf32>
    %cst_24 = arith.constant dense<0.000000e+00> : vector<1x512xf32>
    %87 = tpu.matmul %78, %0, %cst_24 {dimension_numbers = #tpu.dot_dimension_numbers<[1], [0], [0], [1], [0, 0, 1, 1], [], []>} : vector<1x128xf32>, vector<128x512xf32>, vector<1x512xf32> -> vector<1x512xf32>
    %88 = arith.addf %86, %87 : vector<1x512xf32>
    %89 = vector.extract_strided_slice %88 {offsets = [0, 0], sizes = [1, 384], strides = [1, 1]} : vector<1x512xf32> to vector<1x384xf32>
    %90 = arith.negf %89 : vector<1x384xf32>
    %91 = math.exp %90 : vector<1x384xf32>
    %cst_25 = arith.constant 1.000000e+00 : f32
    %92 = vector.broadcast %cst_25 : f32 to vector<1x384xf32>
    %93 = arith.addf %92, %91 : vector<1x384xf32>
    %94 = arith.divf %92, %93 : vector<1x384xf32>
    %95 = vector.extract_strided_slice %94 {offsets = [0, 0], sizes = [1, 128], strides = [1, 1]} : vector<1x384xf32> to vector<1x128xf32>
    %96 = vector.extract_strided_slice %94 {offsets = [0, 128], sizes = [1, 128], strides = [1, 1]} : vector<1x384xf32> to vector<1x128xf32>
    %97 = vector.extract_strided_slice %94 {offsets = [0, 256], sizes = [1, 128], strides = [1, 1]} : vector<1x384xf32> to vector<1x128xf32>
    %98 = vector.extract_strided_slice %88 {offsets = [0, 384], sizes = [1, 128], strides = [1, 1]} : vector<1x512xf32> to vector<1x128xf32>
    %99 = math.tanh %98 : vector<1x128xf32>
    %100 = arith.mulf %96, %76 : vector<1x128xf32>
    %101 = arith.mulf %95, %99 : vector<1x128xf32>
    %102 = arith.addf %100, %101 : vector<1x128xf32>
    %103 = math.tanh %102 : vector<1x128xf32>
    %104 = arith.mulf %97, %103 : vector<1x128xf32>
    %105 = arith.index_cast %c3_i32 : i32 to index
    %c0_26 = arith.constant 0 : index
    %106 = vector.load %arg6[%105, %c0_26] : memref<8x128xf32, #tpu.memory_space<vmem>>, vector<1x128xf32>
    tpu.vector_store %arg6[%105, %c0_26], %104 {strides = array<i32>} : memref<8x128xf32, #tpu.memory_space<vmem>>, vector<1x128xf32>,
    %c4_i32 = arith.constant 4 : i32
    %107 = arith.index_cast %c4_i32 : i32 to index
    %108 = memref.load %arg1[%107] : memref<8xi32, #tpu.memory_space<smem>>
    %c0_i32_27 = arith.constant 0 : i32
    %c15_i32_28 = arith.constant 15 : i32
    %109 = arith.maxsi %c0_i32_27, %108 : i32
    %110 = arith.minsi %c15_i32_28, %109 : i32
    %111 = arith.index_cast %110 : i32 to index
    %c0_29 = arith.constant 0 : index
    %112 = vector.load %arg2[%111, %c0_29] : memref<16x512xf32, #tpu.memory_space<vmem>>, vector<1x512xf32>
    %cst_30 = arith.constant dense<0.000000e+00> : vector<1x512xf32>
    %113 = tpu.matmul %104, %0, %cst_30 {dimension_numbers = #tpu.dot_dimension_numbers<[1], [0], [0], [1], [0, 0, 1, 1], [], []>} : vector<1x128xf32>, vector<128x512xf32>, vector<1x512xf32> -> vector<1x512xf32>
    %114 = arith.addf %112, %113 : vector<1x512xf32>
    %115 = vector.extract_strided_slice %114 {offsets = [0, 0], sizes = [1, 384], strides = [1, 1]} : vector<1x512xf32> to vector<1x384xf32>
    %116 = arith.negf %115 : vector<1x384xf32>
    %117 = math.exp %116 : vector<1x384xf32>
    %cst_31 = arith.constant 1.000000e+00 : f32
    %118 = vector.broadcast %cst_31 : f32 to vector<1x384xf32>
    %119 = arith.addf %118, %117 : vector<1x384xf32>
    %120 = arith.divf %118, %119 : vector<1x384xf32>
    %121 = vector.extract_strided_slice %120 {offsets = [0, 0], sizes = [1, 128], strides = [1, 1]} : vector<1x384xf32> to vector<1x128xf32>
    %122 = vector.extract_strided_slice %120 {offsets = [0, 128], sizes = [1, 128], strides = [1, 1]} : vector<1x384xf32> to vector<1x128xf32>
    %123 = vector.extract_strided_slice %120 {offsets = [0, 256], sizes = [1, 128], strides = [1, 1]} : vector<1x384xf32> to vector<1x128xf32>
    %124 = vector.extract_strided_slice %114 {offsets = [0, 384], sizes = [1, 128], strides = [1, 1]} : vector<1x512xf32> to vector<1x128xf32>
    %125 = math.tanh %124 : vector<1x128xf32>
    %126 = arith.mulf %122, %102 : vector<1x128xf32>
    %127 = arith.mulf %121, %125 : vector<1x128xf32>
    %128 = arith.addf %126, %127 : vector<1x128xf32>
    %129 = math.tanh %128 : vector<1x128xf32>
    %130 = arith.mulf %123, %129 : vector<1x128xf32>
    %131 = arith.index_cast %c4_i32 : i32 to index
    %c0_32 = arith.constant 0 : index
    %132 = vector.load %arg6[%131, %c0_32] : memref<8x128xf32, #tpu.memory_space<vmem>>, vector<1x128xf32>
    tpu.vector_store %arg6[%131, %c0_32], %130 {strides = array<i32>} : memref<8x128xf32, #tpu.memory_space<vmem>>, vector<1x128xf32>,
    %c5_i32 = arith.constant 5 : i32
    %133 = arith.index_cast %c5_i32 : i32 to index
    %134 = memref.load %arg1[%133] : memref<8xi32, #tpu.memory_space<smem>>
    %c0_i32_33 = arith.constant 0 : i32
    %c15_i32_34 = arith.constant 15 : i32
    %135 = arith.maxsi %c0_i32_33, %134 : i32
    %136 = arith.minsi %c15_i32_34, %135 : i32
    %137 = arith.index_cast %136 : i32 to index
    %c0_35 = arith.constant 0 : index
    %138 = vector.load %arg2[%137, %c0_35] : memref<16x512xf32, #tpu.memory_space<vmem>>, vector<1x512xf32>
    %cst_36 = arith.constant dense<0.000000e+00> : vector<1x512xf32>
    %139 = tpu.matmul %130, %0, %cst_36 {dimension_numbers = #tpu.dot_dimension_numbers<[1], [0], [0], [1], [0, 0, 1, 1], [], []>} : vector<1x128xf32>, vector<128x512xf32>, vector<1x512xf32> -> vector<1x512xf32>
    %140 = arith.addf %138, %139 : vector<1x512xf32>
    %141 = vector.extract_strided_slice %140 {offsets = [0, 0], sizes = [1, 384], strides = [1, 1]} : vector<1x512xf32> to vector<1x384xf32>
    %142 = arith.negf %141 : vector<1x384xf32>
    %143 = math.exp %142 : vector<1x384xf32>
    %cst_37 = arith.constant 1.000000e+00 : f32
    %144 = vector.broadcast %cst_37 : f32 to vector<1x384xf32>
    %145 = arith.addf %144, %143 : vector<1x384xf32>
    %146 = arith.divf %144, %145 : vector<1x384xf32>
    %147 = vector.extract_strided_slice %146 {offsets = [0, 0], sizes = [1, 128], strides = [1, 1]} : vector<1x384xf32> to vector<1x128xf32>
    %148 = vector.extract_strided_slice %146 {offsets = [0, 128], sizes = [1, 128], strides = [1, 1]} : vector<1x384xf32> to vector<1x128xf32>
    %149 = vector.extract_strided_slice %146 {offsets = [0, 256], sizes = [1, 128], strides = [1, 1]} : vector<1x384xf32> to vector<1x128xf32>
    %150 = vector.extract_strided_slice %140 {offsets = [0, 384], sizes = [1, 128], strides = [1, 1]} : vector<1x512xf32> to vector<1x128xf32>
    %151 = math.tanh %150 : vector<1x128xf32>
    %152 = arith.mulf %148, %128 : vector<1x128xf32>
    %153 = arith.mulf %147, %151 : vector<1x128xf32>
    %154 = arith.addf %152, %153 : vector<1x128xf32>
    %155 = math.tanh %154 : vector<1x128xf32>
    %156 = arith.mulf %149, %155 : vector<1x128xf32>
    %157 = arith.index_cast %c5_i32 : i32 to index
    %c0_38 = arith.constant 0 : index
    %158 = vector.load %arg6[%157, %c0_38] : memref<8x128xf32, #tpu.memory_space<vmem>>, vector<1x128xf32>
    tpu.vector_store %arg6[%157, %c0_38], %156 {strides = array<i32>} : memref<8x128xf32, #tpu.memory_space<vmem>>, vector<1x128xf32>,
    %c6_i32 = arith.constant 6 : i32
    %159 = arith.index_cast %c6_i32 : i32 to index
    %160 = memref.load %arg1[%159] : memref<8xi32, #tpu.memory_space<smem>>
    %c0_i32_39 = arith.constant 0 : i32
    %c15_i32_40 = arith.constant 15 : i32
    %161 = arith.maxsi %c0_i32_39, %160 : i32
    %162 = arith.minsi %c15_i32_40, %161 : i32
    %163 = arith.index_cast %162 : i32 to index
    %c0_41 = arith.constant 0 : index
    %164 = vector.load %arg2[%163, %c0_41] : memref<16x512xf32, #tpu.memory_space<vmem>>, vector<1x512xf32>
    %cst_42 = arith.constant dense<0.000000e+00> : vector<1x512xf32>
    %165 = tpu.matmul %156, %0, %cst_42 {dimension_numbers = #tpu.dot_dimension_numbers<[1], [0], [0], [1], [0, 0, 1, 1], [], []>} : vector<1x128xf32>, vector<128x512xf32>, vector<1x512xf32> -> vector<1x512xf32>
    %166 = arith.addf %164, %165 : vector<1x512xf32>
    %167 = vector.extract_strided_slice %166 {offsets = [0, 0], sizes = [1, 384], strides = [1, 1]} : vector<1x512xf32> to vector<1x384xf32>
    %168 = arith.negf %167 : vector<1x384xf32>
    %169 = math.exp %168 : vector<1x384xf32>
    %cst_43 = arith.constant 1.000000e+00 : f32
    %170 = vector.broadcast %cst_43 : f32 to vector<1x384xf32>
    %171 = arith.addf %170, %169 : vector<1x384xf32>
    %172 = arith.divf %170, %171 : vector<1x384xf32>
    %173 = vector.extract_strided_slice %172 {offsets = [0, 0], sizes = [1, 128], strides = [1, 1]} : vector<1x384xf32> to vector<1x128xf32>
    %174 = vector.extract_strided_slice %172 {offsets = [0, 128], sizes = [1, 128], strides = [1, 1]} : vector<1x384xf32> to vector<1x128xf32>
    %175 = vector.extract_strided_slice %172 {offsets = [0, 256], sizes = [1, 128], strides = [1, 1]} : vector<1x384xf32> to vector<1x128xf32>
    %176 = vector.extract_strided_slice %166 {offsets = [0, 384], sizes = [1, 128], strides = [1, 1]} : vector<1x512xf32> to vector<1x128xf32>
    %177 = math.tanh %176 : vector<1x128xf32>
    %178 = arith.mulf %174, %154 : vector<1x128xf32>
    %179 = arith.mulf %173, %177 : vector<1x128xf32>
    %180 = arith.addf %178, %179 : vector<1x128xf32>
    %181 = math.tanh %180 : vector<1x128xf32>
    %182 = arith.mulf %175, %181 : vector<1x128xf32>
    %183 = arith.index_cast %c6_i32 : i32 to index
    %c0_44 = arith.constant 0 : index
    %184 = vector.load %arg6[%183, %c0_44] : memref<8x128xf32, #tpu.memory_space<vmem>>, vector<1x128xf32>
    tpu.vector_store %arg6[%183, %c0_44], %182 {strides = array<i32>} : memref<8x128xf32, #tpu.memory_space<vmem>>, vector<1x128xf32>,
    %c7_i32 = arith.constant 7 : i32
    %185 = arith.index_cast %c7_i32 : i32 to index
    %186 = memref.load %arg1[%185] : memref<8xi32, #tpu.memory_space<smem>>
    %c0_i32_45 = arith.constant 0 : i32
    %c15_i32_46 = arith.constant 15 : i32
    %187 = arith.maxsi %c0_i32_45, %186 : i32
    %188 = arith.minsi %c15_i32_46, %187 : i32
    %189 = arith.index_cast %188 : i32 to index
    %c0_47 = arith.constant 0 : index
    %190 = vector.load %arg2[%189, %c0_47] : memref<16x512xf32, #tpu.memory_space<vmem>>, vector<1x512xf32>
    %cst_48 = arith.constant dense<0.000000e+00> : vector<1x512xf32>
    %191 = tpu.matmul %182, %0, %cst_48 {dimension_numbers = #tpu.dot_dimension_numbers<[1], [0], [0], [1], [0, 0, 1, 1], [], []>} : vector<1x128xf32>, vector<128x512xf32>, vector<1x512xf32> -> vector<1x512xf32>
    %192 = arith.addf %190, %191 : vector<1x512xf32>
    %193 = vector.extract_strided_slice %192 {offsets = [0, 0], sizes = [1, 384], strides = [1, 1]} : vector<1x512xf32> to vector<1x384xf32>
    %194 = arith.negf %193 : vector<1x384xf32>
    %195 = math.exp %194 : vector<1x384xf32>
    %cst_49 = arith.constant 1.000000e+00 : f32
    %196 = vector.broadcast %cst_49 : f32 to vector<1x384xf32>
    %197 = arith.addf %196, %195 : vector<1x384xf32>
    %198 = arith.divf %196, %197 : vector<1x384xf32>
    %199 = vector.extract_strided_slice %198 {offsets = [0, 0], sizes = [1, 128], strides = [1, 1]} : vector<1x384xf32> to vector<1x128xf32>
    %200 = vector.extract_strided_slice %198 {offsets = [0, 128], sizes = [1, 128], strides = [1, 1]} : vector<1x384xf32> to vector<1x128xf32>
    %201 = vector.extract_strided_slice %198 {offsets = [0, 256], sizes = [1, 128], strides = [1, 1]} : vector<1x384xf32> to vector<1x128xf32>
    %202 = vector.extract_strided_slice %192 {offsets = [0, 384], sizes = [1, 128], strides = [1, 1]} : vector<1x512xf32> to vector<1x128xf32>
    %203 = math.tanh %202 : vector<1x128xf32>
    %204 = arith.mulf %200, %180 : vector<1x128xf32>
    %205 = arith.mulf %199, %203 : vector<1x128xf32>
    %206 = arith.addf %204, %205 : vector<1x128xf32>
    %207 = math.tanh %206 : vector<1x128xf32>
    %208 = arith.mulf %201, %207 : vector<1x128xf32>
    %209 = arith.index_cast %c7_i32 : i32 to index
    %c0_50 = arith.constant 0 : index
    %210 = vector.load %arg6[%209, %c0_50] : memref<8x128xf32, #tpu.memory_space<vmem>>, vector<1x128xf32>
    tpu.vector_store %arg6[%209, %c0_50], %208 {strides = array<i32>} : memref<8x128xf32, #tpu.memory_space<vmem>>, vector<1x128xf32>,
    %c8_i32 = arith.constant 8 : i32
    %c0_51 = arith.constant 0 : index
    %c0_52 = arith.constant 0 : index
    %211 = vector.load %arg7[%c0_51, %c0_52] : memref<1x128xf32, #tpu.memory_space<vmem>>, vector<1x128xf32>
    tpu.vector_store %arg7[%c0_51, %c0_52], %206 {strides = array<i32>} : memref<1x128xf32, #tpu.memory_space<vmem>>, vector<1x128xf32>,
    return
  }
  func.func @transform_0(%arg0: i32, %arg1: memref<8xi32, #tpu.memory_space<smem>>) -> (i32, i32) {
    %c0_i32 = arith.constant 0 : i32
    %c0_i32_0 = arith.constant 0 : i32
    %c0_i32_1 = arith.constant 0 : i32
    return %c0_i32, %c0_i32_0 : i32, i32
  }
  func.func @transform_1(%arg0: i32, %arg1: memref<8xi32, #tpu.memory_space<smem>>) -> (i32, i32) {
    %c0_i32 = arith.constant 0 : i32
    %c0_i32_0 = arith.constant 0 : i32
    %c0_i32_1 = arith.constant 0 : i32
    return %c0_i32, %c0_i32_0 : i32, i32
  }
  func.func @transform_2(%arg0: i32, %arg1: memref<8xi32, #tpu.memory_space<smem>>) -> (i32, i32) {
    %c0_i32 = arith.constant 0 : i32
    %c0_i32_0 = arith.constant 0 : i32
    %c0_i32_1 = arith.constant 0 : i32
    return %c0_i32, %c0_i32_0 : i32, i32
  }
  func.func @transform_3(%arg0: i32, %arg1: memref<8xi32, #tpu.memory_space<smem>>) -> (i32, i32) {
    %c0_i32 = arith.constant 0 : i32
    %c0_i32_0 = arith.constant 0 : i32
    %c0_i32_1 = arith.constant 0 : i32
    return %c0_i32, %c0_i32_0 : i32, i32
  }
  func.func @transform_4(%arg0: i32, %arg1: memref<8xi32, #tpu.memory_space<smem>>) -> (i32, i32) {
    %c0_i32 = arith.constant 0 : i32
    %c0_i32_0 = arith.constant 0 : i32
    %c0_i32_1 = arith.constant 0 : i32
    return %c0_i32, %c0_i32_0 : i32, i32
  }
  func.func @transform_5(%arg0: i32, %arg1: memref<8xi32, #tpu.memory_space<smem>>) -> (i32, i32) {
    %c0_i32 = arith.constant 0 : i32
    %c0_i32_0 = arith.constant 0 : i32
    %c0_i32_1 = arith.constant 0 : i32
    return %c0_i32, %c0_i32_0 : i32, i32
  }
}

</mosaic_0001>

<bundles_post_ra>
// kernel: tpu_custom_call.1
= control target key start
LH: loop header
LB: loop body
LE: loop exit
PB: predicated region body
PF: predicated region fallthrough
CT: control target
= control target key end

     0   :  { %s3115_s0 = inlined_call_operand.hbm [shape: s32[8], index: 0, kind: input, shape index: {}]   ;;  %s3116_s1 = inlined_call_operand.hbm [shape: f32[16,512], index: 1, kind: input, shape index: {}]   ;;  %s3117_s2 = inlined_call_operand.hbm [shape: f32[128,512], index: 2, kind: input, shape index: {}]   ;;  %s3118_s3 = inlined_call_operand.vmem [shape: f32[1,128], index: 3, kind: input, shape index: {}]   ;;  %s3119_s4 = inlined_call_operand.vmem [shape: f32[1,128], index: 4, kind: input, shape index: {}]   ;;  %s3120_s5 = inlined_call_operand.hbm [shape: f32[8,128], index: 5, kind: output, shape index: {0}]   ;;  %s3121_s6 = inlined_call_operand.hbm [shape: f32[1,128], index: 6, kind: output, shape index: {1}]  }
   0x1   :  { %s2511_s23 = scalar_lea.hbm %s3115_s0, 16 }
   0x2   :  { %p2512_p0 = scmp.ne.s32.totalorder %s3115_s0, %s2511_s23  ;;  %p2515_p1 = scmp.lt.u32.totalorder %s2511_s23, %s3115_s0 }
   0x4   :  { %p2517_p2 = pnand %p2515_p1, %p2512_p0 }
   0x6   :  { %2520 = shalt.err (!%p2517_p2)  }
   0x7   :  { %s2619_s28 = smov [#allocation3]  }
   0x8   :  { %13 = dma.hbm_to_smem %s3115_s0, 16, %s2619_s28, [#allocation2] }
   0x9   :  { %2609 = dma.done.wait [#allocation2], 16 }
   0xa   :  { %2610 = vsyncadd [#allocation2], 4294967280 }
   0xb   :  { %15 = sfence }
   0xc   :  { %16 = vsyncpa [#allocation5], 0 }
   0xd   :  { %17 = vsyncpa [#allocation8], 0 }
   0xe   :  { %18 = vsyncpa [#allocation6], 0 }
   0xf   :  { %19 = vsyncpa [#allocation11], 0  ;;  %s2620_s7 = smov [#allocation4]   ;;  %s2521_s11 = scalar_lea.hbm %s3116_s1, 1024 }
  0x10   :  { %s25_s8 = sshll.u32 %s2620_s7, 4  ;;  %p2522_p3 = scmp.ne.s32.totalorder %s3116_s1, %s2521_s11  ;;  %s26_s8 = int_to_ptr.vmem [resolvable:$true] %s25_s8 }
  0x11   :  { %p2525_p4 = scmp.lt.u32.totalorder %s2521_s11, %s3116_s1 }
  0x13   :  { %p2527_p5 = pnand %p2525_p4, %p2522_p3 }
  0x15   :  { %2530 = shalt.err (!%p2527_p5)
}
  0x16   :  { %s2531_s15 = scalar_lea.vmem %s26_s8, 1024  ;;  %p2536_p7 = scmp.lt.s32.totalorder %s26_s8, %s26_s8 }
  0x17   :  { %p2532_p6 = scmp.ne.s32.totalorder %s26_s8, %s2531_s15  ;;  %p2537_p8 = scmp.lt.s32.totalorder %s2531_s15, %s2531_s15 }
  0x19   :  { %p2538_p9 = por %p2537_p8, %p2536_p7 }
  0x1b   :  { %p2539_p10 = pnand %p2538_p9, %p2532_p6 }
  0x1d   :  { %2542 = shalt.err (!%p2539_p10)
}
  0x1e   :  { %s2621_s16 = smov 512   ;;  %s2622_s17 = smov 32  }
  0x1f   :  { %31 = dma.hbm_to_vmem [thread:$0]  %s3116_s1, 1024, %s26_s8, [#allocation5], %s2621_s16, %s2621_s16, %s2622_s17  }
  0x20   :  { %s2623_s20 = smov [#allocation7]   ;;  %s2543_s24 = scalar_lea.hbm %s3117_s2, 8192 }
  0x21   :  { %s37_s21 = sshll.u32 %s2623_s20, 4  ;;  %p2544_p11 = scmp.ne.s32.totalorder %s3117_s2, %s2543_s24  ;;  %s38_s21 = int_to_ptr.vmem [resolvable:$true] %s37_s21 }
  0x22   :  { %p2547_p12 = scmp.lt.u32.totalorder %s2543_s24, %s3117_s2 }
  0x24   :  { %p2549_p13 = pnand %p2547_p12, %p2544_p11 }
  0x26   :  { %2552 = shalt.err (!%p2549_p13)
}
  0x27   :  { %s2553_s29 = scalar_lea.vmem %s38_s21, 8192  ;;  %p2558_p1 = scmp.lt.s32.totalorder %s38_s21, %s38_s21 }
  0x28   :  { %p2554_p0 = scmp.ne.s32.totalorder %s38_s21, %s2553_s29  ;;  %p2559_p2 = scmp.lt.s32.totalorder %s2553_s29, %s2553_s29 }
  0x2a   :  { %p2560_p3 = por %p2559_p2, %p2558_p1 }
  0x2c   :  { %p2561_p4 = pnand %p2560_p3, %p2554_p0 }
  0x2e   :  { %2564 = shalt.err (!%p2561_p4)
}
  0x2f   :  { %43 = dma.hbm_to_vmem [thread:$0]  %s3117_s2, 8192, %s38_s21, [#allocation8], %s2621_s16, %s2621_s16, %s2622_s17  }
  0x30   :  { %2611 = dma.done.wait [#allocation5], 1024  }
  0x31   :  { %2612 = vsyncadd [#allocation5], 4294966272 }
  0x32   :  { %2613 = dma.done.wait [#allocation8], 8192  }
  0x33   :  { %2614 = vsyncadd [#allocation8], 4294959104  ;;  %v2624_v0 = vmov 0.0   ;;  %v55_v1 = vld [vmem:[#allocation7 + $0x8] sm:$0xff]  ;;  %v57_v3 = vld [vmem:[#allocation7 + $0x18] sm:$0xff]  ;;  %s1848_s21 = sld [smem:[#allocation3 + $0x2]] }
  0x34   :  { %198 = vmatprep.mubr.f32.mxu0 %v2624_v0  ;;  %269 = vmatprep.mubr.f32.mxu1 %v2624_v0  ;;  %v59_v2 = vld [vmem:[#allocation7 + $0x28] sm:$0xff]  ;;  %v61_v5 = vld [vmem:[#allocation7 + $0x38] sm:$0xff]  ;;  %v54_v6 = vld [vmem:[#allocation7] sm:$0xff]  ;;  %s1857_s28 = sld [smem:[#allocation3 + $0x3]]  ;;  %s1875_s0 = sld [smem:[#allocation3 + $0x5]] }
  0x35   :  { %v2701_v4 = vpack.c.bf16 %v59_v2, %v55_v1  ;;  %v58_v7 = vld [vmem:[#allocation7 + $0x20] sm:$0xff]  ;;  %v2703_v8 = vpack.c.bf16 %v61_v5, %v57_v3  ;;  %v56_v10 = vld [vmem:[#allocation7 + $0x10] sm:$0xff]  ;;  %v63_v12 = vld [vmem:[#allocation7 + $0x48] sm:$0xff] }
  0x36   :  { %v2705_v9 = vpack.c.bf16 %v58_v7, %v54_v6  ;;  %v60_v11 = vld [vmem:[#allocation7 + $0x30] sm:$0xff]  ;;  %v67_v14 = vld [vmem:[#allocation7 + $0x68] sm:$0xff]  ;;  %v65_v15 = vld [vmem:[#allocation7 + $0x58] sm:$0xff] }
  0x37   :  { %1927 = vmatprep.subr.bf16.mxu0 %v2701_v4  ;;  %v2708_v13 = vpack.c.bf16 %v60_v11, %v56_v10  ;;  %v69_v16 = vld [vmem:[#allocation7 + $0x78] sm:$0xff]  ;;  %1959 = vmatprep.subr.bf16.mxu1 %v2703_v8  ;;  %v2712_v17 = vpack.c.bf16 %v67_v14, %v63_v12  ;;  %v62_v19 = vld [vmem:[#allocation7 + $0x40] sm:$0xff]  ;;  %v64_v21 = vld [vmem:[#allocation7 + $0x50] sm:$0xff] }
  0x38   :  { %1929 = vmatpush1.bf16.msra.mxu0 %v2705_v9  ;;  %v2714_v18 = vpack.c.bf16 %v69_v16, %v65_v15  ;;  %v66_v20 = vld [vmem:[#allocation7 + $0x60] sm:$0xff]  ;;  %v68_v23 = vld [vmem:[#allocation7 + $0x70] sm:$0xff]  ;;  %v71_v24 = vld [vmem:[#allocation7 + $0x88] sm:$0xff] }
  0x39   :  { %1961 = vmatpush1.bf16.msra.mxu1 %v2708_v13  ;;  %v2717_v22 = vpack.c.bf16 %v66_v20, %v62_v19  ;;  %v75_v25 = vld [vmem:[#allocation7 + $0xa8] sm:$0xff]  ;;  %1931 = vmatprep.subr.bf16.mxu0 %v2712_v17  ;;  %v2721_v26 = vpack.c.bf16 %v68_v23, %v64_v21  ;;  %v73_v28 = vld [vmem:[#allocation7 + $0x98] sm:$0xff]  ;;  %v70_v30 = vld [vmem:[#allocation7 + $0x80] sm:$0xff]  ;;  %p535_p9 = scmp.gt.s32.totalorder %s1848_s21, 0  ;;  %p1849_p10 = scmp.lt.s32.totalorder %s1848_s21, 15 }
  0x3a   :  { %1963 = vmatprep.subr.bf16.mxu1 %v2714_v18  ;;  %v2723_v27 = vpack.c.bf16 %v75_v25, %v71_v24  ;;  %v77_v29 = vld [vmem:[#allocation7 + $0xb8] sm:$0xff]  ;;  %v74_v32 = vld [vmem:[#allocation7 + $0xa0] sm:$0xff]  ;;  %v72_v33 = vld [vmem:[#allocation7 + $0x90] sm:$0xff]  ;;  %p742_p11 = scmp.gt.s32.totalorder %s1857_s28, 0  ;;  %p1858_p12 = scmp.lt.s32.totalorder %s1857_s28, 15 }
  0x3b   :  { %v2725_v31 = vpack.c.bf16 %v77_v29, %v73_v28  ;;  %v76_v34 = vld [vmem:[#allocation7 + $0xb0] sm:$0xff]  ;;  %v2728_v35 = vpack.c.bf16 %v74_v32, %v70_v30  ;;  %v79_v36 = vld [vmem:[#allocation7 + $0xc8] sm:$0xff]  ;;  %v81_v38 = vld [vmem:[#allocation7 + $0xd8] sm:$0xff]  ;;  %s536_s22 = scalar_select %p535_p9, %s1848_s21, 0 }
  0x3c   :  { %1933 = vmatpush1.bf16.msra.mxu0 %v2717_v22  ;;  %v83_v37 = vld [vmem:[#allocation7 + $0xe8] sm:$0xff]  ;;  %v2732_v39 = vpack.c.bf16 %v76_v34, %v72_v33  ;;  %v85_v41 = vld [vmem:[#allocation7 + $0xf8] sm:$0xff]  ;;  %v78_v42 = vld [vmem:[#allocation7 + $0xc0] sm:$0xff]  ;;  %s743_s29 = scalar_select %p742_p11, %s1857_s28, 0 }
  0x3d   :  { %1965 = vmatpush1.bf16.msra.mxu1 %v2721_v26  ;;  %1935 = vmatprep.subr.bf16.mxu0 %v2723_v27  ;;  %v2734_v40 = vpack.c.bf16 %v83_v37, %v79_v36  ;;  %v82_v43 = vld [vmem:[#allocation7 + $0xe0] sm:$0xff]  ;;  %v2737_v44 = vpack.c.bf16 %v85_v41, %v81_v38  ;;  %v80_v45 = vld [vmem:[#allocation7 + $0xd0] sm:$0xff]  ;;  %v87_v47 = vld [vmem:[#allocation7 + $0x108] sm:$0xff]  ;;  %s3127_s22 = smov (!%p1849_p10, %s536_s22), 15  ;;  %p1156_p1 = scmp.gt.s32.totalorder %s1875_s0, 0 }
  0x3e   :  { %1967 = vmatprep.subr.bf16.mxu1 %v2725_v31  ;;  %v84_v46 = vld [vmem:[#allocation7 + $0xf0] sm:$0xff]  ;;  %v91_v48 = vld [vmem:[#allocation7 + $0x128] sm:$0xff]  ;;  %v89_v49 = vld [vmem:[#allocation7 + $0x118] sm:$0xff]  ;;  %v2740_v51 = vpack.c.bf16 %v82_v43, %v78_v42  ;;  %s539_s23 = sshra.s32 %s3127_s22, 3  ;;  %s542_s24 = sand.u32 7, %s3127_s22 }
  0x3f   :  { %v93_v50 = vld [vmem:[#allocation7 + $0x138] sm:$0xff]  ;;  %v2744_v52 = vpack.c.bf16 %v84_v46, %v80_v45  ;;  %v2746_v53 = vpack.c.bf16 %v91_v48, %v87_v47  ;;  %v86_v54 = vld [vmem:[#allocation7 + $0x100] sm:$0xff]  ;;  %v88_v56 = vld [vmem:[#allocation7 + $0x110] sm:$0xff]  ;;  %s1910_s25 = sshll.u32 %s539_s23, 5  ;;  %s3129_s29 = smov (!%p1858_p12, %s743_s29), 15 }
  0x40   :  { %1937 = vmatpush1.bf16.msra.mxu0 %v2728_v35  ;;  %v90_v55 = vld [vmem:[#allocation7 + $0x120] sm:$0xff]  ;;  %v2749_v57 = vpack.c.bf16 %v93_v50, %v89_v49  ;;  %v92_v58 = vld [vmem:[#allocation7 + $0x130] sm:$0xff]  ;;  %v95_v59 = vld [vmem:[#allocation7 + $0x148] sm:$0xff]  ;;  %v2625_v49 = vmov 1966171168   ;;  %s545_s26 = sadd.s32 %s1910_s25, %s542_s24  ;;  %s746_s1 = sshra.s32 %s3129_s29, 3 }
  0x41   :  { %1969 = vmatpush1.bf16.msra.mxu1 %v2732_v39  ;;  %1939 = vmatprep.subr.bf16.mxu0 %v2734_v40  ;;  %v99_v60 = vld [vmem:[#allocation7 + $0x168] sm:$0xff]  ;;  %v97_v61 = vld [vmem:[#allocation7 + $0x158] sm:$0xff]  ;;  %v2752_v63 = vpack.c.bf16 %v90_v55, %v86_v54  ;;  %v2756_v1 = vpack.c.bf16 %v92_v58, %v88_v56  ;;  %v94_v3 = vld [vmem:[#allocation7 + $0x140] sm:$0xff]  ;;  %v283_v50 = vunpack.c.l.s4 %v2625_v49  ;;  %v285_v54 = vlaneseq  ;;  %s546_s27 = scalar_lea.vmem [#allocation4], %s545_s26  ;;  %s749_s30 = sand.u32 7, %s3129_s29 }
  0x42   :  { %1971 = vmatprep.subr.bf16.mxu1 %v2737_v44  ;;  %v101_v62 = vld [vmem:[#allocation7 + $0x178] sm:$0xff]  ;;  %v2758_v2 = vpack.c.bf16 %v99_v60, %v95_v59  ;;  %v98_v5 = vld [vmem:[#allocation7 + $0x160] sm:$0xff]  ;;  %v96_v6 = vld [vmem:[#allocation7 + $0x150] sm:$0xff]  ;;  %s1913_s2 = sshll.u32 %s746_s1, 5  ;;  %p1876_p2 = scmp.lt.s32.totalorder %s1875_s0, 15 }
  0x43   :  { %v2761_v7 = vpack.c.bf16 %v101_v62, %v97_v61  ;;  %v100_v10 = vld [vmem:[#allocation7 + $0x170] sm:$0xff]  ;;  %v103_v11 = vld [vmem:[#allocation7 + $0x188] sm:$0xff]  ;;  %v105_v14 = vld [vmem:[#allocation7 + $0x198] sm:$0xff]  ;;  %v2764_v16 = vpack.c.bf16 %v98_v5, %v94_v3  ;;  %v284_v55 = vunpack.c.0.s8 %v283_v50  ;;  %v286_v56 = vshrl.u32 %v285_v54, 7  ;;  %s752_s7 = sadd.s32 %s1913_s2, %s749_s30 }
  0x44   :  { %1941 = vmatpush1.bf16.msra.mxu0 %v2740_v51  ;;  %v107_v12 = vld [vmem:[#allocation7 + $0x1a8] sm:$0xff]  ;;  %v109_v15 = vld [vmem:[#allocation7 + $0x1b8] sm:$0xff]  ;;  %v2768_v19 = vpack.c.bf16 %v100_v10, %v96_v6  ;;  %v102_v21 = vld [vmem:[#allocation7 + $0x180] sm:$0xff] }
  0x45   :  { %1973 = vmatpush1.bf16.msra.mxu1 %v2744_v52  ;;  %1943 = vmatprep.subr.bf16.mxu0 %v2746_v53  ;;  %v2770_v20 = vpack.c.bf16 %v107_v12, %v103_v11  ;;  %v106_v23 = vld [vmem:[#allocation7 + $0x1a0] sm:$0xff]  ;;  %v104_v24 = vld [vmem:[#allocation7 + $0x190] sm:$0xff]  ;;  %v2773_v25 = vpack.c.bf16 %v109_v15, %v105_v14  ;;  %v111_v29 = vld [vmem:[#allocation7 + $0x1c8] sm:$0xff]  ;;  %v2836_v59 = vsub.s32 %v284_v55, %v286_v56 }
  0x46   :  { %1975 = vmatprep.subr.bf16.mxu1 %v2749_v57  ;;  %v108_v28 = vld [vmem:[#allocation7 + $0x1b0] sm:$0xff]  ;;  %v115_v30 = vld [vmem:[#allocation7 + $0x1e8] sm:$0xff]  ;;  %v113_v32 = vld [vmem:[#allocation7 + $0x1d8] sm:$0xff]  ;;  %v2776_v34 = vpack.c.bf16 %v106_v23, %v102_v21 }
  0x47   :  { %v117_v33 = vld [vmem:[#allocation7 + $0x1f8] sm:$0xff]  ;;  %v2780_v36 = vpack.c.bf16 %v108_v28, %v104_v24  ;;  %v2782_v37 = vpack.c.bf16 %v115_v30, %v111_v29  ;;  %v110_v38 = vld [vmem:[#allocation7 + $0x1c0] sm:$0xff]  ;;  %v112_v43 = vld [vmem:[#allocation7 + $0x1d0] sm:$0xff] }
  0x48   :  { %1945 = vmatpush1.bf16.msra.mxu0 %v2752_v63  ;;  %v114_v41 = vld [vmem:[#allocation7 + $0x1e0] sm:$0xff]  ;;  %v2785_v42 = vpack.c.bf16 %v117_v33, %v113_v32  ;;  %v116_v45 = vld [vmem:[#allocation7 + $0x1f0] sm:$0xff] }
  0x49   :  { %1977 = vmatpush1.bf16.msra.mxu1 %v2756_v1  ;;  %1947 = vmatprep.subr.bf16.mxu0 %v2758_v2  ;;  %v2788_v46 = vpack.c.bf16 %v114_v41, %v110_v38  ;;  %v2792_v47 = vpack.c.bf16 %v116_v45, %v112_v43  ;;  %v118_v48 = vld [vmem:[%s3118_s3] sm:$0x1]  ;;  %s120_s3 = sld [smem:[#allocation3]] }
  0x4a   :  { %1979 = vmatprep.subr.bf16.mxu1 %v2761_v7  ;;  %v119_v30 = vld [vmem:[%s3119_s4] sm:$0x1]  ;;  %s1839_s4 = sld [smem:[#allocation3 + $0x1]] }
  0x4c   :  { %1949 = vmatpush1.bf16.msra.mxu0 %v2764_v16 }
  0x4d   :  { %1981 = vmatpush1.bf16.msra.mxu1 %v2768_v19  ;;  %1951 = vmatprep.subr.bf16.mxu0 %v2770_v20 }
  0x4e   :  { %1983 = vmatprep.subr.bf16.mxu1 %v2773_v25 }
  0x4f   :  { %p121_p5 = scmp.gt.s32.totalorder %s120_s3, 0  ;;  %p1831_p6 = scmp.lt.s32.totalorder %s120_s3, 15 }
  0x50   :  { %1953 = vmatpush1.bf16.msra.mxu0 %v2776_v34  ;;  %p328_p7 = scmp.gt.s32.totalorder %s1839_s4, 0  ;;  %p1840_p8 = scmp.lt.s32.totalorder %s1839_s4, 15 }
  0x51   :  { %1985 = vmatpush1.bf16.msra.mxu1 %v2780_v36  ;;  %1955 = vmatprep.subr.bf16.mxu0 %v2782_v37  ;;  %s122_s8 = scalar_select %p121_p5, %s120_s3, 0 }
  0x52   :  { %1987 = vmatprep.subr.bf16.mxu1 %v2785_v42  ;;  %s329_s15 = scalar_select %p328_p7, %s1839_s4, 0 }
  0x53   :  { %s3123_s8 = smov (!%p1831_p6, %s122_s8), 15  ;;  %s753_s3 = scalar_lea.vmem [#allocation4], %s752_s7 }
  0x54   :  { %1957 = vmatpush1.bf16.msra.mxu0 %v2788_v46  ;;  %s125_s9 = sshra.s32 %s3123_s8, 3  ;;  %s128_s10 = sand.u32 7, %s3123_s8 }
  0x55   :  { %1989 = vmatpush1.bf16.msra.mxu1 %v2792_v47  ;;  %1991 = vmatprep.subr.bf16.mxu0 %v2701_v4  ;;  %s1904_s11 = sshll.u32 %s125_s9, 5  ;;  %s3125_s15 = smov (!%p1840_p8, %s329_s15), 15 }
  0x56   :  { %2023 = vmatprep.subr.bf16.mxu1 %v2703_v8  ;;  %s131_s12 = sadd.s32 %s1904_s11, %s128_s10  ;;  %s332_s16 = sshra.s32 %s3125_s15, 3 }
  0x57   :  { %199 = vmatmul.mubr.f32.vlgmr.msra.gmra.mrb[0].mxu0 %v118_v48  ;;  %s132_s13 = scalar_lea.vmem [#allocation4], %s131_s12  ;;  %s335_s17 = sand.u32 7, %s3125_s15 }
  0x58   :  { %270 = vmatmul.mubr.f32.vlgmr.msra.gmra.mrb[0].mxu1 %v118_v48  ;;  %1993 = vmatpush1.bf16.msra.mxu0 %v2705_v9  ;;  %v133_v12 = vld [vmem:[%s132_s13] ss:$8 sm:$0xf]  ;;  %s1907_s18 = sshll.u32 %s332_s16, 5  ;;  %s1866_s8 = sld [smem:[#allocation3 + $0x4]] }
  0x59   :  { %2025 = vmatpush1.bf16.msra.mxu1 %v2708_v13  ;;  %1995 = vmatprep.subr.bf16.mxu0 %v2712_v17  ;;  %s338_s19 = sadd.s32 %s1907_s18, %s335_s17 }
  0x5a   :  { %2027 = vmatprep.subr.bf16.mxu1 %v2714_v18  ;;  %405 = vmatprep.mubr.f32.mxu0 %v2624_v0  ;;  %s339_s20 = scalar_lea.vmem [#allocation4], %s338_s19 }
  0x5b   :  { %476 = vmatprep.mubr.f32.mxu1 %v2624_v0  ;;  %s1157_s4 = scalar_select %p1156_p1, %s1875_s0, 0 }
  0x5c   :  { %1997 = vmatpush1.bf16.msra.mxu0 %v2717_v22 }
  0x5d   :  { %2029 = vmatpush1.bf16.msra.mxu1 %v2721_v26  ;;  %1999 = vmatprep.subr.bf16.mxu0 %v2723_v27  ;;  %s3133_s4 = smov (!%p1876_p2, %s1157_s4), 15 }
  0x5e   :  { %2031 = vmatprep.subr.bf16.mxu1 %v2725_v31  ;;  %p949_p13 = scmp.gt.s32.totalorder %s1866_s8, 0  ;;  %p1867_p0 = scmp.lt.s32.totalorder %s1866_s8, 15 }
  0x5f   :  { %s1160_s15 = sshra.s32 %s3133_s4, 3  ;;  %s1163_s16 = sand.u32 7, %s3133_s4 }
  0x60   :  { %2001 = vmatpush1.bf16.msra.mxu0 %v2728_v35  ;;  %s950_s9 = scalar_select %p949_p13, %s1866_s8, 0 }
  0x61   :  { %2033 = vmatpush1.bf16.msra.mxu1 %v2732_v39  ;;  %2003 = vmatprep.subr.bf16.mxu0 %v2734_v40  ;;  %s1919_s17 = sshll.u32 %s1160_s15, 5 }
  0x62   :  { %2035 = vmatprep.subr.bf16.mxu1 %v2737_v44  ;;  %s3131_s9 = smov (!%p1867_p0, %s950_s9), 15  ;;  %s1166_s18 = sadd.s32 %s1919_s17, %s1163_s16 }
  0x63   :  { %s953_s10 = sshra.s32 %s3131_s9, 3  ;;  %s956_s11 = sand.u32 7, %s3131_s9 }
  0x64   :  { %2005 = vmatpush1.bf16.msra.mxu0 %v2740_v51  ;;  %s1916_s12 = sshll.u32 %s953_s10, 5  ;;  %s1167_s19 = scalar_lea.vmem [#allocation4], %s1166_s18 }
  0x65   :  { %2037 = vmatpush1.bf16.msra.mxu1 %v2744_v52  ;;  %2007 = vmatprep.subr.bf16.mxu0 %v2746_v53  ;;  %s959_s13 = sadd.s32 %s1916_s12, %s956_s11 }
  0x66   :  { %2039 = vmatprep.subr.bf16.mxu1 %v2749_v57  ;;  %s960_s14 = scalar_lea.vmem [#allocation4], %s959_s13 }
  0x68   :  { %2009 = vmatpush1.bf16.msra.mxu0 %v2752_v63 }
  0x69   :  { %2041 = vmatpush1.bf16.msra.mxu1 %v2756_v1  ;;  %2011 = vmatprep.subr.bf16.mxu0 %v2758_v2 }
  0x6a   :  { %2043 = vmatprep.subr.bf16.mxu1 %v2761_v7 }
  0x6c   :  { %2013 = vmatpush1.bf16.msra.mxu0 %v2764_v16 }
  0x6d   :  { %2045 = vmatpush1.bf16.msra.mxu1 %v2768_v19  ;;  %2015 = vmatprep.subr.bf16.mxu0 %v2770_v20 }
  0x6e   :  { %2047 = vmatprep.subr.bf16.mxu1 %v2773_v25 }
  0x70   :  { %2017 = vmatpush1.bf16.msra.mxu0 %v2776_v34 }
  0x71   :  { %2049 = vmatpush1.bf16.msra.mxu1 %v2780_v36  ;;  %2019 = vmatprep.subr.bf16.mxu0 %v2782_v37 }
  0x72   :  { %2051 = vmatprep.subr.bf16.mxu1 %v2785_v42 }
  0x74   :  { %2021 = vmatpush1.bf16.msra.mxu0 %v2788_v46 }
  0x75   :  { %2053 = vmatpush1.bf16.msra.mxu1 %v2792_v47  ;;  %2055 = vmatprep.subr.bf16.mxu0 %v2701_v4 }
  0x76   :  { %2087 = vmatprep.subr.bf16.mxu1 %v2703_v8 }
 0x12a   :  { %v200_v58 = vpop.f32.mrb[0].mxu0 }
 0x12b   :  { %v271_v60 = vpop.f32.mrb[0].mxu1  ;;  %v202_v61 = vpop.f32.mrb[1].mxu0 }
 0x12c   :  { %v280_v62 = vcombine.low %v200_v58, %v202_v61  ;;  %v273_v3 = vpop.f32.mrb[1].mxu1 }
 0x12d   :  { %v281_v5 = vcombine.low %v271_v60, %v273_v3 }
 0x12e   :  { %v288_v6 = vrot.slane %v280_v62, %v2836_v59 }
 0x12f   :  { %v295_v10 = vrot.slane %v281_v5, %v2836_v59  ;;  %v340_v5 = vld [vmem:[%s339_s20] ss:$8 sm:$0xf]  ;;  %s1884_s20 = sld [smem:[#allocation3 + $0x6]] }
 0x131   :  { %v296_v11 = vcombine.low %v288_v6, %v295_v10 }
 0x133   :  { %v303_v14 = vrot.slane %v296_v11, %v2836_v59 }
 0x135   :  { %v305_v15 = vadd.f32 %v303_v14, %v133_v12  ;;  %p1363_p3 = scmp.gt.s32.totalorder %s1884_s20, 0  ;;  %p1885_p4 = scmp.lt.s32.totalorder %s1884_s20, 15 }
 0x137   :  { %v1838_v21 = vmul.f32 -1.442695, %v305_v15  ;;  %v313_v28 = vrot.slane %v305_v15, 3  ;;  %s1364_s21 = scalar_select %p1363_p3, %s1884_s20, 0 }
 0x139   :  { %2447 = vpow2.f32 %v1838_v21  ;;  %s3135_s21 = smov (!%p1885_p4, %s1364_s21), 15 }
 0x13a   :  { %s1367_s22 = sshra.s32 %s3135_s21, 3  ;;  %s1370_s23 = sand.u32 7, %s3135_s21 }
 0x13b   :  { %s1922_s24 = sshll.u32 %s1367_s22, 5 }
 0x13c   :  { %s1373_s25 = sadd.s32 %s1922_s24, %s1370_s23 }
 0x13d   :  { %s1374_s26 = scalar_lea.vmem [#allocation4], %s1373_s25 }
 0x143   :  { %v2448_v23 = vpop.eup %2447 }
 0x144   :  { %v309_v24 = vadd.f32 1.0, %v2448_v23 }
 0x146   :  { %2449 = vrcp.f32 %v309_v24 }
 0x147   :  { %2451 = vtanh.f32 %v313_v28 }
 0x150   :  { %v2450_v29 = vpop.eup %2449 }
 0x151   :  { %v317_v32 = vrot.slane %v2450_v29, 1  ;;  %v2452_v33 = vpop.eup %2451  ;;  %v323_v45 = vrot.slane %v2450_v29, 2 }
 0x152   :  { %v320_v38 = vmul.f32 %v2452_v33, %v2450_v29 }
 0x153   :  { %v319_v41 = vmul.f32 %v317_v32, %v119_v30 }
 0x155   :  { %v2844_v43 = vadd.f32 %v320_v38, %v319_v41 }
 0x157   :  { %2453 = vtanh.f32 %v2844_v43 }
 0x161   :  { %v2454_v48 = vpop.eup %2453 }
 0x162   :  { %v325_v49 = vmul.f32 %v2454_v48, %v323_v45 }
 0x164   :  { %326 = vst [vmem:[#allocation9] sm:$0x1] %v325_v49  ;;  %406 = vmatmul.mubr.f32.vlgmr.msra.gmra.mrb[2].mxu0 %v325_v49  ;;  %477 = vmatmul.mubr.f32.vlgmr.msra.gmra.mrb[2].mxu1 %v325_v49 }
 0x165   :  { %2057 = vmatpush1.bf16.msra.mxu0 %v2705_v9  ;;  %2089 = vmatpush1.bf16.msra.mxu1 %v2708_v13 }
 0x166   :  { %2059 = vmatprep.subr.bf16.mxu0 %v2712_v17  ;;  %2091 = vmatprep.subr.bf16.mxu1 %v2714_v18 }
 0x167   :  { %612 = vmatprep.mubr.f32.mxu0 %v2624_v0  ;;  %683 = vmatprep.mubr.f32.mxu1 %v2624_v0 }
 0x169   :  { %2061 = vmatpush1.bf16.msra.mxu0 %v2717_v22  ;;  %2093 = vmatpush1.bf16.msra.mxu1 %v2721_v26 }
 0x16a   :  { %2063 = vmatprep.subr.bf16.mxu0 %v2723_v27  ;;  %2095 = vmatprep.subr.bf16.mxu1 %v2725_v31 }
 0x16d   :  { %2065 = vmatpush1.bf16.msra.mxu0 %v2728_v35  ;;  %2097 = vmatpush1.bf16.msra.mxu1 %v2732_v39 }
 0x16e   :  { %2067 = vmatprep.subr.bf16.mxu0 %v2734_v40  ;;  %2099 = vmatprep.subr.bf16.mxu1 %v2737_v44 }
 0x171   :  { %2069 = vmatpush1.bf16.msra.mxu0 %v2740_v51  ;;  %2101 = vmatpush1.bf16.msra.mxu1 %v2744_v52 }
 0x172   :  { %2071 = vmatprep.subr.bf16.mxu0 %v2746_v53  ;;  %2103 = vmatprep.subr.bf16.mxu1 %v2749_v57 }
 0x175   :  { %2073 = vmatpush1.bf16.msra.mxu0 %v2752_v63  ;;  %2105 = vmatpush1.bf16.msra.mxu1 %v2756_v1 }
 0x176   :  { %2075 = vmatprep.subr.bf16.mxu0 %v2758_v2  ;;  %2107 = vmatprep.subr.bf16.mxu1 %v2761_v7 }
 0x179   :  { %2077 = vmatpush1.bf16.msra.mxu0 %v2764_v16  ;;  %2109 = vmatpush1.bf16.msra.mxu1 %v2768_v19 }
 0x17a   :  { %2079 = vmatprep.subr.bf16.mxu0 %v2770_v20  ;;  %2111 = vmatprep.subr.bf16.mxu1 %v2773_v25 }
 0x17d   :  { %2081 = vmatpush1.bf16.msra.mxu0 %v2776_v34  ;;  %2113 = vmatpush1.bf16.msra.mxu1 %v2780_v36 }
 0x17e   :  { %2083 = vmatprep.subr.bf16.mxu0 %v2782_v37  ;;  %2115 = vmatprep.subr.bf16.mxu1 %v2785_v42 }
 0x181   :  { %2085 = vmatpush1.bf16.msra.mxu0 %v2788_v46  ;;  %2117 = vmatpush1.bf16.msra.mxu1 %v2792_v47 }
 0x182   :  { %2119 = vmatprep.subr.bf16.mxu0 %v2701_v4  ;;  %2151 = vmatprep.subr.bf16.mxu1 %v2703_v8 }
 0x237   :  { %v407_v50 = vpop.f32.mrb[2].mxu0  ;;  %v478_v54 = vpop.f32.mrb[2].mxu1 }
 0x238   :  { %v409_v55 = vpop.f32.mrb[3].mxu0  ;;  %v480_v56 = vpop.f32.mrb[3].mxu1 }
 0x239   :  { %v487_v58 = vcombine.low %v407_v50, %v409_v55  ;;  %v488_v60 = vcombine.low %v478_v54, %v480_v56 }
 0x23b   :  { %v495_v61 = vrot.slane %v487_v58, %v2836_v59  ;;  %v502_v62 = vrot.slane %v488_v60, %v2836_v59  ;;  %v547_v58 = vld [vmem:[%s546_s27] ss:$8 sm:$0xf]  ;;  %s1893_s27 = sld [smem:[#allocation3 + $0x7]] }
 0x23d   :  { %v503_v3 = vcombine.low %v495_v61, %v502_v62 }
 0x23f   :  { %v510_v6 = vrot.slane %v503_v3, %v2836_v59 }
 0x241   :  { %v512_v10 = vadd.f32 %v510_v6, %v340_v5  ;;  %p1570_p5 = scmp.gt.s32.totalorder %s1893_s27, 0  ;;  %p1894_p6 = scmp.lt.s32.totalorder %s1893_s27, 15 }
 0x243   :  { %v1847_v11 = vmul.f32 -1.442695, %v512_v10  ;;  %v520_v15 = vrot.slane %v512_v10, 3  ;;  %s1571_s28 = scalar_select %p1570_p5, %s1893_s27, 0 }
 0x245   :  { %2455 = vpow2.f32 %v1847_v11  ;;  %s3137_s28 = smov (!%p1894_p6, %s1571_s28), 15 }
 0x246   :  { %s1574_s29 = sshra.s32 %s3137_s28, 3  ;;  %s1577_s1 = sand.u32 7, %s3137_s28 }
 0x247   :  { %s1925_s30 = sshll.u32 %s1574_s29, 5 }
 0x248   :  { %s1580_s2 = sadd.s32 %s1925_s30, %s1577_s1 }
 0x249   :  { %s1581_s7 = scalar_lea.vmem [#allocation4], %s1580_s2 }
 0x24f   :  { %v2456_v12 = vpop.eup %2455 }
 0x250   :  { %v516_v14 = vadd.f32 1.0, %v2456_v12 }
 0x252   :  { %2457 = vrcp.f32 %v516_v14 }
 0x253   :  { %2459 = vtanh.f32 %v520_v15 }
 0x25c   :  { %v2458_v21 = vpop.eup %2457 }
 0x25d   :  { %v524_v23 = vrot.slane %v2458_v21, 1  ;;  %v2460_v24 = vpop.eup %2459  ;;  %v530_v32 = vrot.slane %v2458_v21, 2 }
 0x25e   :  { %v527_v28 = vmul.f32 %v2460_v24, %v2458_v21 }
 0x25f   :  { %v526_v29 = vmul.f32 %v524_v23, %v2844_v43 }
 0x261   :  { %v2885_v30 = vadd.f32 %v527_v28, %v526_v29 }
 0x263   :  { %2461 = vtanh.f32 %v2885_v30 }
 0x26d   :  { %v2462_v33 = vpop.eup %2461 }
 0x26e   :  { %v532_v38 = vmul.f32 %v2462_v33, %v530_v32 }
 0x270   :  { %533 = vst [vmem:[#allocation9 + $0x1] sm:$0x1] %v532_v38  ;;  %613 = vmatmul.mubr.f32.vlgmr.msra.gmra.mrb[4].mxu0 %v532_v38  ;;  %684 = vmatmul.mubr.f32.vlgmr.msra.gmra.mrb[4].mxu1 %v532_v38 }
 0x271   :  { %2121 = vmatpush1.bf16.msra.mxu0 %v2705_v9  ;;  %2153 = vmatpush1.bf16.msra.mxu1 %v2708_v13 }
 0x272   :  { %2123 = vmatprep.subr.bf16.mxu0 %v2712_v17  ;;  %2155 = vmatprep.subr.bf16.mxu1 %v2714_v18 }
 0x273   :  { %819 = vmatprep.mubr.f32.mxu0 %v2624_v0  ;;  %890 = vmatprep.mubr.f32.mxu1 %v2624_v0 }
 0x275   :  { %2125 = vmatpush1.bf16.msra.mxu0 %v2717_v22  ;;  %2157 = vmatpush1.bf16.msra.mxu1 %v2721_v26 }
 0x276   :  { %2127 = vmatprep.subr.bf16.mxu0 %v2723_v27  ;;  %2159 = vmatprep.subr.bf16.mxu1 %v2725_v31 }
 0x279   :  { %2129 = vmatpush1.bf16.msra.mxu0 %v2728_v35  ;;  %2161 = vmatpush1.bf16.msra.mxu1 %v2732_v39 }
 0x27a   :  { %2131 = vmatprep.subr.bf16.mxu0 %v2734_v40  ;;  %2163 = vmatprep.subr.bf16.mxu1 %v2737_v44 }
 0x27d   :  { %2133 = vmatpush1.bf16.msra.mxu0 %v2740_v51  ;;  %2165 = vmatpush1.bf16.msra.mxu1 %v2744_v52 }
 0x27e   :  { %2135 = vmatprep.subr.bf16.mxu0 %v2746_v53  ;;  %2167 = vmatprep.subr.bf16.mxu1 %v2749_v57 }
 0x281   :  { %2137 = vmatpush1.bf16.msra.mxu0 %v2752_v63  ;;  %2169 = vmatpush1.bf16.msra.mxu1 %v2756_v1 }
 0x282   :  { %2139 = vmatprep.subr.bf16.mxu0 %v2758_v2  ;;  %2171 = vmatprep.subr.bf16.mxu1 %v2761_v7 }
 0x285   :  { %2141 = vmatpush1.bf16.msra.mxu0 %v2764_v16  ;;  %2173 = vmatpush1.bf16.msra.mxu1 %v2768_v19 }
 0x286   :  { %2143 = vmatprep.subr.bf16.mxu0 %v2770_v20  ;;  %2175 = vmatprep.subr.bf16.mxu1 %v2773_v25 }
 0x289   :  { %2145 = vmatpush1.bf16.msra.mxu0 %v2776_v34  ;;  %2177 = vmatpush1.bf16.msra.mxu1 %v2780_v36 }
 0x28a   :  { %2147 = vmatprep.subr.bf16.mxu0 %v2782_v37  ;;  %2179 = vmatprep.subr.bf16.mxu1 %v2785_v42 }
 0x28d   :  { %2149 = vmatpush1.bf16.msra.mxu0 %v2788_v46  ;;  %2181 = vmatpush1.bf16.msra.mxu1 %v2792_v47 }
 0x28e   :  { %2183 = vmatprep.subr.bf16.mxu0 %v2701_v4  ;;  %2215 = vmatprep.subr.bf16.mxu1 %v2703_v8 }
 0x343   :  { %v614_v41 = vpop.f32.mrb[4].mxu0  ;;  %v685_v43 = vpop.f32.mrb[4].mxu1 }
 0x344   :  { %v616_v45 = vpop.f32.mrb[5].mxu0  ;;  %v687_v48 = vpop.f32.mrb[5].mxu1 }
 0x345   :  { %v694_v49 = vcombine.low %v614_v41, %v616_v45  ;;  %v695_v50 = vcombine.low %v685_v43, %v687_v48 }
 0x347   :  { %v702_v54 = vrot.slane %v694_v49, %v2836_v59  ;;  %v709_v55 = vrot.slane %v695_v50, %v2836_v59  ;;  %v754_v49 = vld [vmem:[%s753_s3] ss:$8 sm:$0xf]  ;;  %s2626_s3 = smov [#allocation10]  }
 0x348   :  { %s1793_s8 = sshll.u32 %s2626_s3, 4  ;;  %s1794_s8 = int_to_ptr.vmem [resolvable:$true] %s1793_s8 }
 0x349   :  { %v710_v56 = vcombine.low %v702_v54, %v709_v55  ;;  %s2565_s9 = scalar_lea.vmem %s1794_s8, 16  ;;  %s2569_s10 = scalar_lea.vmem %s1794_s8, 32 }
 0x34a   :  { %p2566_p7 = scmp.ne.s32.totalorder %s1794_s8, %s2565_s9  ;;  %p2570_p8 = scmp.lt.s32.totalorder %s1794_s8, %s1794_s8 }
 0x34b   :  { %v717_v60 = vrot.slane %v710_v56, %v2836_v59  ;;  %p2571_p9 = scmp.lt.s32.totalorder %s2569_s10, %s2565_s9 }
 0x34d   :  { %v719_v61 = vadd.f32 %v717_v60, %v547_v58  ;;  %p2572_p10 = por %p2571_p9, %p2570_p8 }
 0x34f   :  { %v1856_v62 = vmul.f32 -1.442695, %v719_v61  ;;  %v727_v6 = vrot.slane %v719_v61, 3  ;;  %p2573_p11 = pnand %p2572_p10, %p2566_p7 }
 0x351   :  { %2463 = vpow2.f32 %v1856_v62 }
 0x35b   :  { %v2464_v3 = vpop.eup %2463 }
 0x35c   :  { %v723_v5 = vadd.f32 1.0, %v2464_v3 }
 0x35e   :  { %2465 = vrcp.f32 %v723_v5 }
 0x35f   :  { %2467 = vtanh.f32 %v727_v6 }
 0x368   :  { %v2466_v10 = vpop.eup %2465 }
 0x369   :  { %v731_v11 = vrot.slane %v2466_v10, 1  ;;  %v2468_v12 = vpop.eup %2467  ;;  %v737_v23 = vrot.slane %v2466_v10, 2 }
 0x36a   :  { %v734_v14 = vmul.f32 %v2468_v12, %v2466_v10 }
 0x36b   :  { %v733_v15 = vmul.f32 %v731_v11, %v2885_v30 }
 0x36d   :  { %v2926_v21 = vadd.f32 %v734_v14, %v733_v15 }
 0x36f   :  { %2469 = vtanh.f32 %v2926_v21 }
 0x379   :  { %v2470_v24 = vpop.eup %2469 }
 0x37a   :  { %v739_v28 = vmul.f32 %v2470_v24, %v737_v23 }
 0x37c   :  { %740 = vst [vmem:[#allocation9 + $0x2] sm:$0x1] %v739_v28  ;;  %820 = vmatmul.mubr.f32.vlgmr.msra.gmra.mrb[6].mxu0 %v739_v28  ;;  %891 = vmatmul.mubr.f32.vlgmr.msra.gmra.mrb[6].mxu1 %v739_v28 }
 0x37d   :  { %2185 = vmatpush1.bf16.msra.mxu0 %v2705_v9  ;;  %2217 = vmatpush1.bf16.msra.mxu1 %v2708_v13 }
 0x37e   :  { %2187 = vmatprep.subr.bf16.mxu0 %v2712_v17  ;;  %2219 = vmatprep.subr.bf16.mxu1 %v2714_v18 }
 0x37f   :  { %1026 = vmatprep.mubr.f32.mxu0 %v2624_v0  ;;  %1097 = vmatprep.mubr.f32.mxu1 %v2624_v0 }
 0x381   :  { %2189 = vmatpush1.bf16.msra.mxu0 %v2717_v22  ;;  %2221 = vmatpush1.bf16.msra.mxu1 %v2721_v26 }
 0x382   :  { %2191 = vmatprep.subr.bf16.mxu0 %v2723_v27  ;;  %2223 = vmatprep.subr.bf16.mxu1 %v2725_v31 }
 0x385   :  { %2193 = vmatpush1.bf16.msra.mxu0 %v2728_v35  ;;  %2225 = vmatpush1.bf16.msra.mxu1 %v2732_v39 }
 0x386   :  { %2195 = vmatprep.subr.bf16.mxu0 %v2734_v40  ;;  %2227 = vmatprep.subr.bf16.mxu1 %v2737_v44 }
 0x389   :  { %2197 = vmatpush1.bf16.msra.mxu0 %v2740_v51  ;;  %2229 = vmatpush1.bf16.msra.mxu1 %v2744_v52 }
 0x38a   :  { %2199 = vmatprep.subr.bf16.mxu0 %v2746_v53  ;;  %2231 = vmatprep.subr.bf16.mxu1 %v2749_v57 }
 0x38d   :  { %2201 = vmatpush1.bf16.msra.mxu0 %v2752_v63  ;;  %2233 = vmatpush1.bf16.msra.mxu1 %v2756_v1 }
 0x38e   :  { %2203 = vmatprep.subr.bf16.mxu0 %v2758_v2  ;;  %2235 = vmatprep.subr.bf16.mxu1 %v2761_v7 }
 0x391   :  { %2205 = vmatpush1.bf16.msra.mxu0 %v2764_v16  ;;  %2237 = vmatpush1.bf16.msra.mxu1 %v2768_v19 }
 0x392   :  { %2207 = vmatprep.subr.bf16.mxu0 %v2770_v20  ;;  %2239 = vmatprep.subr.bf16.mxu1 %v2773_v25 }
 0x395   :  { %2209 = vmatpush1.bf16.msra.mxu0 %v2776_v34  ;;  %2241 = vmatpush1.bf16.msra.mxu1 %v2780_v36 }
 0x396   :  { %2211 = vmatprep.subr.bf16.mxu0 %v2782_v37  ;;  %2243 = vmatprep.subr.bf16.mxu1 %v2785_v42 }
 0x399   :  { %2213 = vmatpush1.bf16.msra.mxu0 %v2788_v46  ;;  %2245 = vmatpush1.bf16.msra.mxu1 %v2792_v47 }
 0x39a   :  { %2247 = vmatprep.subr.bf16.mxu0 %v2701_v4  ;;  %2279 = vmatprep.subr.bf16.mxu1 %v2703_v8 }
 0x44f   :  { %v821_v29 = vpop.f32.mrb[6].mxu0  ;;  %v892_v30 = vpop.f32.mrb[6].mxu1 }
 0x450   :  { %v823_v32 = vpop.f32.mrb[7].mxu0  ;;  %v894_v33 = vpop.f32.mrb[7].mxu1 }
 0x451   :  { %v901_v38 = vcombine.low %v821_v29, %v823_v32  ;;  %v902_v41 = vcombine.low %v892_v30, %v894_v33 }
 0x453   :  { %v909_v43 = vrot.slane %v901_v38, %v2836_v59  ;;  %v916_v45 = vrot.slane %v902_v41, %v2836_v59  ;;  %v961_v38 = vld [vmem:[%s960_s14] ss:$8 sm:$0xf] }
 0x455   :  { %v917_v48 = vcombine.low %v909_v43, %v916_v45 }
 0x457   :  { %v924_v50 = vrot.slane %v917_v48, %v2836_v59 }
 0x459   :  { %v926_v54 = vadd.f32 %v924_v50, %v754_v49 }
 0x45b   :  { %v1865_v55 = vmul.f32 -1.442695, %v926_v54  ;;  %v934_v60 = vrot.slane %v926_v54, 3 }
 0x45d   :  { %2471 = vpow2.f32 %v1865_v55 }
 0x467   :  { %v2472_v56 = vpop.eup %2471 }
 0x468   :  { %v930_v58 = vadd.f32 1.0, %v2472_v56 }
 0x46a   :  { %2473 = vrcp.f32 %v930_v58 }
 0x46b   :  { %2475 = vtanh.f32 %v934_v60 }
 0x474   :  { %v2474_v61 = vpop.eup %2473 }
 0x475   :  { %v938_v62 = vrot.slane %v2474_v61, 1  ;;  %v2476_v3 = vpop.eup %2475  ;;  %v944_v11 = vrot.slane %v2474_v61, 2 }
 0x476   :  { %v941_v5 = vmul.f32 %v2476_v3, %v2474_v61 }
 0x477   :  { %v940_v6 = vmul.f32 %v938_v62, %v2926_v21 }
 0x479   :  { %v2967_v10 = vadd.f32 %v941_v5, %v940_v6 }
 0x47b   :  { %2477 = vtanh.f32 %v2967_v10 }
 0x485   :  { %v2478_v12 = vpop.eup %2477 }
 0x486   :  { %v946_v14 = vmul.f32 %v2478_v12, %v944_v11 }
 0x488   :  { %947 = vst [vmem:[#allocation9 + $0x3] sm:$0x1] %v946_v14  ;;  %1027 = vmatmul.mubr.f32.vlgmr.msra.gmra.mrb[8].mxu0 %v946_v14  ;;  %1098 = vmatmul.mubr.f32.vlgmr.msra.gmra.mrb[8].mxu1 %v946_v14 }
 0x489   :  { %2249 = vmatpush1.bf16.msra.mxu0 %v2705_v9  ;;  %2281 = vmatpush1.bf16.msra.mxu1 %v2708_v13 }
 0x48a   :  { %2251 = vmatprep.subr.bf16.mxu0 %v2712_v17  ;;  %2283 = vmatprep.subr.bf16.mxu1 %v2714_v18 }
 0x48b   :  { %1233 = vmatprep.mubr.f32.mxu0 %v2624_v0  ;;  %1304 = vmatprep.mubr.f32.mxu1 %v2624_v0 }
 0x48d   :  { %2253 = vmatpush1.bf16.msra.mxu0 %v2717_v22  ;;  %2285 = vmatpush1.bf16.msra.mxu1 %v2721_v26 }
 0x48e   :  { %2255 = vmatprep.subr.bf16.mxu0 %v2723_v27  ;;  %2287 = vmatprep.subr.bf16.mxu1 %v2725_v31 }
 0x491   :  { %2257 = vmatpush1.bf16.msra.mxu0 %v2728_v35  ;;  %2289 = vmatpush1.bf16.msra.mxu1 %v2732_v39 }
 0x492   :  { %2259 = vmatprep.subr.bf16.mxu0 %v2734_v40  ;;  %2291 = vmatprep.subr.bf16.mxu1 %v2737_v44 }
 0x495   :  { %2261 = vmatpush1.bf16.msra.mxu0 %v2740_v51  ;;  %2293 = vmatpush1.bf16.msra.mxu1 %v2744_v52 }
 0x496   :  { %2263 = vmatprep.subr.bf16.mxu0 %v2746_v53  ;;  %2295 = vmatprep.subr.bf16.mxu1 %v2749_v57 }
 0x499   :  { %2265 = vmatpush1.bf16.msra.mxu0 %v2752_v63  ;;  %2297 = vmatpush1.bf16.msra.mxu1 %v2756_v1 }
 0x49a   :  { %2267 = vmatprep.subr.bf16.mxu0 %v2758_v2  ;;  %2299 = vmatprep.subr.bf16.mxu1 %v2761_v7 }
 0x49d   :  { %2269 = vmatpush1.bf16.msra.mxu0 %v2764_v16  ;;  %2301 = vmatpush1.bf16.msra.mxu1 %v2768_v19 }
 0x49e   :  { %2271 = vmatprep.subr.bf16.mxu0 %v2770_v20  ;;  %2303 = vmatprep.subr.bf16.mxu1 %v2773_v25 }
 0x4a1   :  { %2273 = vmatpush1.bf16.msra.mxu0 %v2776_v34  ;;  %2305 = vmatpush1.bf16.msra.mxu1 %v2780_v36 }
 0x4a2   :  { %2275 = vmatprep.subr.bf16.mxu0 %v2782_v37  ;;  %2307 = vmatprep.subr.bf16.mxu1 %v2785_v42 }
 0x4a5   :  { %2277 = vmatpush1.bf16.msra.mxu0 %v2788_v46  ;;  %2309 = vmatpush1.bf16.msra.mxu1 %v2792_v47 }
 0x4a6   :  { %2311 = vmatprep.subr.bf16.mxu0 %v2701_v4  ;;  %2343 = vmatprep.subr.bf16.mxu1 %v2703_v8 }
 0x55b   :  { %v1028_v15 = vpop.f32.mrb[8].mxu0  ;;  %v1099_v21 = vpop.f32.mrb[8].mxu1 }
 0x55c   :  { %v1030_v23 = vpop.f32.mrb[9].mxu0  ;;  %v1101_v24 = vpop.f32.mrb[9].mxu1 }
 0x55d   :  { %v1108_v28 = vcombine.low %v1028_v15, %v1030_v23  ;;  %v1109_v29 = vcombine.low %v1099_v21, %v1101_v24  ;;  %v1168_v23 = vld [vmem:[%s1167_s19] ss:$8 sm:$0xf] }
 0x55f   :  { %v1116_v30 = vrot.slane %v1108_v28, %v2836_v59  ;;  %v1123_v32 = vrot.slane %v1109_v29, %v2836_v59 }
 0x561   :  { %v1124_v33 = vcombine.low %v1116_v30, %v1123_v32 }
 0x563   :  { %v1131_v41 = vrot.slane %v1124_v33, %v2836_v59 }
 0x565   :  { %v1133_v43 = vadd.f32 %v1131_v41, %v961_v38 }
 0x567   :  { %v1874_v45 = vmul.f32 -1.442695, %v1133_v43  ;;  %v1141_v50 = vrot.slane %v1133_v43, 3 }
 0x569   :  { %2479 = vpow2.f32 %v1874_v45 }
 0x573   :  { %v2480_v48 = vpop.eup %2479 }
 0x574   :  { %v1137_v49 = vadd.f32 1.0, %v2480_v48 }
 0x576   :  { %2481 = vrcp.f32 %v1137_v49 }
 0x577   :  { %2483 = vtanh.f32 %v1141_v50 }
 0x580   :  { %v2482_v54 = vpop.eup %2481 }
 0x581   :  { %v1145_v55 = vrot.slane %v2482_v54, 1  ;;  %v2484_v56 = vpop.eup %2483  ;;  %v1151_v62 = vrot.slane %v2482_v54, 2 }
 0x582   :  { %v1148_v58 = vmul.f32 %v2484_v56, %v2482_v54 }
 0x583   :  { %v1147_v60 = vmul.f32 %v1145_v55, %v2967_v10 }
 0x585   :  { %v3008_v61 = vadd.f32 %v1148_v58, %v1147_v60 }
 0x587   :  { %2485 = vtanh.f32 %v3008_v61 }
 0x591   :  { %v2486_v3 = vpop.eup %2485 }
 0x592   :  { %v1153_v5 = vmul.f32 %v2486_v3, %v1151_v62 }
 0x594   :  { %1154 = vst [vmem:[#allocation9 + $0x4] sm:$0x1] %v1153_v5  ;;  %1234 = vmatmul.mubr.f32.vlgmr.msra.gmra.mrb[10].mxu0 %v1153_v5  ;;  %1305 = vmatmul.mubr.f32.vlgmr.msra.gmra.mrb[10].mxu1 %v1153_v5 }
 0x595   :  { %2313 = vmatpush1.bf16.msra.mxu0 %v2705_v9  ;;  %2345 = vmatpush1.bf16.msra.mxu1 %v2708_v13 }
 0x596   :  { %2315 = vmatprep.subr.bf16.mxu0 %v2712_v17  ;;  %2347 = vmatprep.subr.bf16.mxu1 %v2714_v18 }
 0x597   :  { %1440 = vmatprep.mubr.f32.mxu0 %v2624_v0  ;;  %1511 = vmatprep.mubr.f32.mxu1 %v2624_v0 }
 0x599   :  { %2317 = vmatpush1.bf16.msra.mxu0 %v2717_v22  ;;  %2349 = vmatpush1.bf16.msra.mxu1 %v2721_v26 }
 0x59a   :  { %2319 = vmatprep.subr.bf16.mxu0 %v2723_v27  ;;  %2351 = vmatprep.subr.bf16.mxu1 %v2725_v31 }
 0x59d   :  { %2321 = vmatpush1.bf16.msra.mxu0 %v2728_v35  ;;  %2353 = vmatpush1.bf16.msra.mxu1 %v2732_v39 }
 0x59e   :  { %2323 = vmatprep.subr.bf16.mxu0 %v2734_v40  ;;  %2355 = vmatprep.subr.bf16.mxu1 %v2737_v44 }
 0x5a1   :  { %2325 = vmatpush1.bf16.msra.mxu0 %v2740_v51  ;;  %2357 = vmatpush1.bf16.msra.mxu1 %v2744_v52 }
 0x5a2   :  { %2327 = vmatprep.subr.bf16.mxu0 %v2746_v53  ;;  %2359 = vmatprep.subr.bf16.mxu1 %v2749_v57 }
 0x5a5   :  { %2329 = vmatpush1.bf16.msra.mxu0 %v2752_v63  ;;  %2361 = vmatpush1.bf16.msra.mxu1 %v2756_v1 }
 0x5a6   :  { %2331 = vmatprep.subr.bf16.mxu0 %v2758_v2  ;;  %2363 = vmatprep.subr.bf16.mxu1 %v2761_v7 }
 0x5a9   :  { %2333 = vmatpush1.bf16.msra.mxu0 %v2764_v16  ;;  %2365 = vmatpush1.bf16.msra.mxu1 %v2768_v19 }
 0x5aa   :  { %2335 = vmatprep.subr.bf16.mxu0 %v2770_v20  ;;  %2367 = vmatprep.subr.bf16.mxu1 %v2773_v25 }
 0x5ad   :  { %2337 = vmatpush1.bf16.msra.mxu0 %v2776_v34  ;;  %2369 = vmatpush1.bf16.msra.mxu1 %v2780_v36 }
 0x5ae   :  { %2339 = vmatprep.subr.bf16.mxu0 %v2782_v37  ;;  %2371 = vmatprep.subr.bf16.mxu1 %v2785_v42 }
 0x5b1   :  { %2341 = vmatpush1.bf16.msra.mxu0 %v2788_v46  ;;  %2373 = vmatpush1.bf16.msra.mxu1 %v2792_v47 }
 0x5b2   :  { %2375 = vmatprep.subr.bf16.mxu0 %v2701_v4  ;;  %2407 = vmatprep.subr.bf16.mxu1 %v2703_v8 }
 0x667   :  { %v1235_v6 = vpop.f32.mrb[10].mxu0  ;;  %v1306_v10 = vpop.f32.mrb[10].mxu1 }
 0x668   :  { %v1237_v11 = vpop.f32.mrb[11].mxu0  ;;  %v1308_v12 = vpop.f32.mrb[11].mxu1 }
 0x669   :  { %v1315_v14 = vcombine.low %v1235_v6, %v1237_v11  ;;  %v1316_v15 = vcombine.low %v1306_v10, %v1308_v12 }
 0x66b   :  { %v1323_v21 = vrot.slane %v1315_v14, %v2836_v59  ;;  %v1330_v4 = vrot.slane %v1316_v15, %v2836_v59 }
 0x66d   :  { %v1331_v8 = vcombine.low %v1323_v21, %v1330_v4 }
 0x66f   :  { %v1338_v24 = vrot.slane %v1331_v8, %v2836_v59 }
 0x671   :  { %v1340_v28 = vadd.f32 %v1338_v24, %v1168_v23 }
 0x673   :  { %v1883_v29 = vmul.f32 -1.442695, %v1340_v28  ;;  %v1348_v33 = vrot.slane %v1340_v28, 3 }
 0x675   :  { %2487 = vpow2.f32 %v1883_v29 }
 0x67f   :  { %v2488_v30 = vpop.eup %2487 }
 0x680   :  { %v1344_v32 = vadd.f32 1.0, %v2488_v30 }
 0x682   :  { %2489 = vrcp.f32 %v1344_v32 }
 0x683   :  { %2491 = vtanh.f32 %v1348_v33 }
 0x68c   :  { %v2490_v38 = vpop.eup %2489 }
 0x68d   :  { %v1352_v41 = vrot.slane %v2490_v38, 1  ;;  %v2492_v43 = vpop.eup %2491  ;;  %v1358_v50 = vrot.slane %v2490_v38, 2 }
 0x68e   :  { %v1355_v45 = vmul.f32 %v2492_v43, %v2490_v38 }
 0x68f   :  { %v1354_v48 = vmul.f32 %v1352_v41, %v3008_v61  ;;  %v1582_v61 = vld [vmem:[%s1581_s7] ss:$8 sm:$0xf] }
 0x691   :  { %v3049_v49 = vadd.f32 %v1355_v45, %v1354_v48 }
 0x693   :  { %2493 = vtanh.f32 %v3049_v49 }
 0x69d   :  { %v2494_v54 = vpop.eup %2493 }
 0x69e   :  { %v1360_v55 = vmul.f32 %v2494_v54, %v1358_v50 }
 0x6a0   :  { %1361 = vst [vmem:[#allocation9 + $0x5] sm:$0x1] %v1360_v55  ;;  %1441 = vmatmul.mubr.f32.vlgmr.msra.gmra.mrb[12].mxu0 %v1360_v55  ;;  %1512 = vmatmul.mubr.f32.vlgmr.msra.gmra.mrb[12].mxu1 %v1360_v55 }
 0x6a1   :  { %2377 = vmatpush1.bf16.msra.mxu0 %v2705_v9  ;;  %2409 = vmatpush1.bf16.msra.mxu1 %v2708_v13 }
 0x6a2   :  { %2379 = vmatprep.subr.bf16.mxu0 %v2712_v17  ;;  %2411 = vmatprep.subr.bf16.mxu1 %v2714_v18 }
 0x6a3   :  { %1647 = vmatprep.mubr.f32.mxu0 %v2624_v0  ;;  %1718 = vmatprep.mubr.f32.mxu1 %v2624_v0 }
 0x6a5   :  { %2381 = vmatpush1.bf16.msra.mxu0 %v2717_v22  ;;  %2413 = vmatpush1.bf16.msra.mxu1 %v2721_v26 }
 0x6a6   :  { %2383 = vmatprep.subr.bf16.mxu0 %v2723_v27  ;;  %2415 = vmatprep.subr.bf16.mxu1 %v2725_v31 }
 0x6a9   :  { %2385 = vmatpush1.bf16.msra.mxu0 %v2728_v35  ;;  %2417 = vmatpush1.bf16.msra.mxu1 %v2732_v39  ;;  %v1375_v35 = vld [vmem:[%s1374_s26] ss:$8 sm:$0xf] }
 0x6aa   :  { %2387 = vmatprep.subr.bf16.mxu0 %v2734_v40  ;;  %2419 = vmatprep.subr.bf16.mxu1 %v2737_v44 }
 0x6ad   :  { %2389 = vmatpush1.bf16.msra.mxu0 %v2740_v51  ;;  %2421 = vmatpush1.bf16.msra.mxu1 %v2744_v52 }
 0x6ae   :  { %2391 = vmatprep.subr.bf16.mxu0 %v2746_v53  ;;  %2423 = vmatprep.subr.bf16.mxu1 %v2749_v57 }
 0x6b1   :  { %2393 = vmatpush1.bf16.msra.mxu0 %v2752_v63  ;;  %2425 = vmatpush1.bf16.msra.mxu1 %v2756_v1 }
 0x6b2   :  { %2395 = vmatprep.subr.bf16.mxu0 %v2758_v2  ;;  %2427 = vmatprep.subr.bf16.mxu1 %v2761_v7 }
 0x6b5   :  { %2397 = vmatpush1.bf16.msra.mxu0 %v2764_v16  ;;  %2429 = vmatpush1.bf16.msra.mxu1 %v2768_v19 }
 0x6b6   :  { %2399 = vmatprep.subr.bf16.mxu0 %v2770_v20  ;;  %2431 = vmatprep.subr.bf16.mxu1 %v2773_v25 }
 0x6b9   :  { %2401 = vmatpush1.bf16.msra.mxu0 %v2776_v34  ;;  %2433 = vmatpush1.bf16.msra.mxu1 %v2780_v36 }
 0x6ba   :  { %2403 = vmatprep.subr.bf16.mxu0 %v2782_v37  ;;  %2435 = vmatprep.subr.bf16.mxu1 %v2785_v42 }
 0x6bd   :  { %2405 = vmatpush1.bf16.msra.mxu0 %v2788_v46  ;;  %2437 = vmatpush1.bf16.msra.mxu1 %v2792_v47 }
 0x773   :  { %v1442_v0 = vpop.f32.mrb[12].mxu0  ;;  %v1513_v9 = vpop.f32.mrb[12].mxu1 }
 0x774   :  { %v1444_v13 = vpop.f32.mrb[13].mxu0  ;;  %v1515_v17 = vpop.f32.mrb[13].mxu1 }
 0x775   :  { %v1522_v18 = vcombine.low %v1442_v0, %v1444_v13  ;;  %v1523_v22 = vcombine.low %v1513_v9, %v1515_v17 }
 0x777   :  { %v1530_v26 = vrot.slane %v1522_v18, %v2836_v59  ;;  %v1537_v27 = vrot.slane %v1523_v22, %v2836_v59 }
 0x779   :  { %v1538_v31 = vcombine.low %v1530_v26, %v1537_v27 }
 0x77b   :  { %v1545_v39 = vrot.slane %v1538_v31, %v2836_v59 }
 0x77d   :  { %v1547_v40 = vadd.f32 %v1545_v39, %v1375_v35 }
 0x77f   :  { %v1892_v44 = vmul.f32 -1.442695, %v1547_v40  ;;  %v1555_v53 = vrot.slane %v1547_v40, 3 }
 0x781   :  { %2495 = vpow2.f32 %v1892_v44 }
 0x78b   :  { %v2496_v51 = vpop.eup %2495 }
 0x78c   :  { %v1551_v52 = vadd.f32 1.0, %v2496_v51 }
 0x78e   :  { %2497 = vrcp.f32 %v1551_v52 }
 0x78f   :  { %2499 = vtanh.f32 %v1555_v53 }
 0x798   :  { %v2498_v57 = vpop.eup %2497 }
 0x799   :  { %v1559_v63 = vrot.slane %v2498_v57, 1  ;;  %v2500_v1 = vpop.eup %2499  ;;  %v1565_v19 = vrot.slane %v2498_v57, 2 }
 0x79a   :  { %v1562_v2 = vmul.f32 %v2500_v1, %v2498_v57 }
 0x79b   :  { %v1561_v7 = vmul.f32 %v1559_v63, %v3049_v49 }
 0x79d   :  { %v1563_v16 = vadd.f32 %v1562_v2, %v1561_v7 }
 0x79f   :  { %2501 = vtanh.f32 %v1563_v16 }
 0x7a9   :  { %v2502_v20 = vpop.eup %2501 }
 0x7aa   :  { %v1567_v25 = vmul.f32 %v2502_v20, %v1565_v19 }
 0x7ac   :  { %1568 = vst [vmem:[#allocation9 + $0x6] sm:$0x1] %v1567_v25  ;;  %1648 = vmatmul.mubr.f32.vlgmr.msra.gmra.mrb[14].mxu0 %v1567_v25  ;;  %1719 = vmatmul.mubr.f32.vlgmr.msra.gmra.mrb[14].mxu1 %v1567_v25 }
 0x87f   :  { %v1649_v34 = vpop.f32.mrb[14].mxu0  ;;  %v1720_v36 = vpop.f32.mrb[14].mxu1 }
 0x880   :  { %v1651_v37 = vpop.f32.mrb[15].mxu0  ;;  %v1722_v42 = vpop.f32.mrb[15].mxu1 }
 0x881   :  { %v1729_v46 = vcombine.low %v1649_v34, %v1651_v37  ;;  %v1730_v47 = vcombine.low %v1720_v36, %v1722_v42 }
 0x883   :  { %v1737_v56 = vrot.slane %v1729_v46, %v2836_v59  ;;  %v1744_v58 = vrot.slane %v1730_v47, %v2836_v59 }
 0x885   :  { %v1745_v60 = vcombine.low %v1737_v56, %v1744_v58 }
 0x887   :  { %v1752_v62 = vrot.slane %v1745_v60, %v2836_v59 }
 0x889   :  { %v1754_v3 = vadd.f32 %v1752_v62, %v1582_v61 }
 0x88b   :  { %v1901_v5 = vmul.f32 -1.442695, %v1754_v3  ;;  %v1762_v11 = vrot.slane %v1754_v3, 3 }
 0x88d   :  { %2503 = vpow2.f32 %v1901_v5 }
 0x897   :  { %v2504_v6 = vpop.eup %2503 }
 0x898   :  { %v1758_v10 = vadd.f32 1.0, %v2504_v6 }
 0x89a   :  { %2505 = vrcp.f32 %v1758_v10 }
 0x89b   :  { %2507 = vtanh.f32 %v1762_v11 }
 0x8a4   :  { %v2506_v12 = vpop.eup %2505 }
 0x8a5   :  { %v1766_v14 = vrot.slane %v2506_v12, 1  ;;  %v2508_v15 = vpop.eup %2507 }
 0x8a6   :  { %v1769_v4 = vmul.f32 %v2508_v15, %v2506_v12 }
 0x8a7   :  { %v1768_v21 = vmul.f32 %v1766_v14, %v1563_v16 }
 0x8a9   :  { %v1770_v8 = vadd.f32 %v1769_v4, %v1768_v21 }
 0x8ab   :  { %2509 = vtanh.f32 %v1770_v8  ;;  %1776 = vst [vmem:[#allocation10] sm:$0x1] %v1770_v8 }
 0x8ac   :  { %2576 = shalt.err (!%p2573_p11)
}
 0x8ad   :  { %s2577_s13 = scalar_lea.hbm %s3121_s6, 16 }
 0x8ae   :  { %p2578_p12 = scmp.ne.s32.totalorder %s3121_s6, %s2577_s13  ;;  %p2581_p13 = scmp.lt.u32.totalorder %s2577_s13, %s3121_s6 }
 0x8b0   :  { %p2583_p0 = pnand %p2581_p13, %p2578_p12 }
 0x8b2   :  { %2586 = shalt.err (!%p2583_p0)
}
 0x8b3   :  { %1796 = dma.vmem_to_hbm [thread:$0]  %s1794_s8, 16, %s3121_s6, [#allocation11]   ;;  %v1772_v59 = vrot.slane %v2506_v12, 2 }
 0x8b4   :  { %s2627_s18 = smov [#allocation9]  }
 0x8b5   :  { %s1783_s19 = sshll.u32 %s2627_s18, 4  ;;  %v2510_v23 = vpop.eup %2509  ;;  %s1784_s19 = int_to_ptr.vmem [resolvable:$true] %s1783_s19 }
 0x8b6   :  { %v1774_v24 = vmul.f32 %v2510_v23, %v1772_v59  ;;  %s2587_s20 = scalar_lea.vmem %s1784_s19, 128  ;;  %p2592_p2 = scmp.lt.s32.totalorder %s1784_s19, %s1784_s19 }
 0x8b7   :  { %p2588_p1 = scmp.ne.s32.totalorder %s1784_s19, %s2587_s20  ;;  %p2593_p3 = scmp.lt.s32.totalorder %s2587_s20, %s2587_s20 }
 0x8b8   :  { %1775 = vst [vmem:[#allocation9 + $0x7] sm:$0x1] %v1774_v24 }
 0x8b9   :  { %p2594_p4 = por %p2593_p3, %p2592_p2 }
 0x8bb   :  { %p2595_p5 = pnand %p2594_p4, %p2588_p1 }
 0x8bd   :  { %2598 = shalt.err (!%p2595_p5)
}
 0x8be   :  { %s2599_s23 = scalar_lea.hbm %s3120_s5, 128 }
 0x8bf   :  { %p2600_p6 = scmp.ne.s32.totalorder %s3120_s5, %s2599_s23  ;;  %p2603_p7 = scmp.lt.u32.totalorder %s2599_s23, %s3120_s5 }
 0x8c1   :  { %p2605_p8 = pnand %p2603_p7, %p2600_p6 }
 0x8c3   :  { %2608 = shalt.err (!%p2605_p8)
}
 0x8c4   :  { %1786 = dma.vmem_to_hbm [thread:$0]  %s1784_s19, 128, %s3120_s5, [#allocation6]  }
 0x8c5   :  { %2615 = dma.done.wait [#allocation6], 128  }
 0x8c6   :  { %2616 = vsyncadd [#allocation6], 4294967168 }
 0x8c7   :  { %2617 = dma.done.wait [#allocation11], 16  }
 0x8c8   :  { %2618 = vsyncadd [#allocation11], 4294967280 }
 0x8c9   :  { %1803 = vsyncpa [#allocation5], 1 }
 0x8ca   :  { %1804 = vsyncpa [#allocation8], 1 }
 0x8cb   :  { %1805 = vsyncpa [#allocation6], 1 }
 0x8cc   :  { %1806 = vsyncpa [#allocation11], 1 }

</bundles_post_ra>
